<compile_context>
chip_gen: v6e
topology: v6e:2x2x1
jax: 0.10.0
libtpu: 0.0.40
codegen_flags: <defaults>
</compile_context>

<pallas_src>
import math
import jax
import jax.numpy as jnp
from jax.experimental import pallas as pl
from jax.experimental.pallas import tpu as pltpu

# ---------------- Llama3Config analog (small synthetic sizes) ----------------
DIM = 128
N_HEADS = 4
N_KV_HEADS = 2
HEAD_DIM = DIM // N_HEADS            # 32
GROUP_SIZE = N_HEADS // N_KV_HEADS   # 2
DKV = N_KV_HEADS * HEAD_DIM          # 64
MULTIPLE_OF = 64
FFN_DIM_MULTIPLIER = None
NORM_EPS = 1e-5
SEQ_LEN = 8
BATCH = 2
ROPE_THETA = 10000.0


def _ffn_hidden(dim):
    hidden = 4 * dim
    hidden = int(2 * hidden / 3)
    if FFN_DIM_MULTIPLIER is not None:
        hidden = int(FFN_DIM_MULTIPLIER * dim)
    return MULTIPLE_OF * ((hidden + MULTIPLE_OF - 1) // MULTIPLE_OF)


HIDDEN = _ffn_hidden(DIM)            # 384
BS = BATCH * SEQ_LEN                 # 16 rows fed to every projection matmul


# -------------------------------- kernel helpers --------------------------------
def _rms_norm(x, w):
    # reproduces the PyTorch module exactly: weight * (x / rsqrt(mean(x^2)+eps))
    ms = jnp.mean(x * x, axis=-1, keepdims=True)
    return w * (x * jnp.sqrt(ms + NORM_EPS))


def _rope(t, cos, sin_m, sin_p):
    # interleaved-pair rotary (torch view_as_complex convention):
    #   out[2i]   = t[2i]*c_i - t[2i+1]*s_i
    #   out[2i+1] = t[2i]*s_i + t[2i+1]*c_i
    # sin_m = (-sin) on even lanes / 0 on odd, sin_p = 0 on even / (+sin) on odd,
    # so the pair swap is two XLU lane rotates + VPU mul/add — no iota/compare/
    # select and no sign multiply.  The wrap-around lanes of each roll land on
    # zeroed table entries, so they contribute nothing.
    w = t.shape[-1]
    return (t * cos
            + pltpu.roll(t, shift=w - 1, axis=1) * sin_m     # == roll(t, -1, axis=-1)
            + pltpu.roll(t, shift=1, axis=1) * sin_p)


def encoder_block_kernel(x_ref, rope_ref,
                         anw_ref, wq_ref, wkv_ref, wo_ref,
                         fnw_ref, w1_ref, w2_ref, w3_ref,
                         o_ref, attn_ref):
    f32 = jnp.float32
    bf16 = jnp.bfloat16

    x = x_ref[...]                                          # (B*S, D) f32
    cos, sin_m, sin_p = rope_ref[0], rope_ref[1], rope_ref[2]   # (B*S, D) each

    # ------------------ attention sub-block ------------------
    xn = _rms_norm(x, anw_ref[...])                         # attention_norm
    xn_b = xn.astype(bf16)                                  # bf16 MXU operands, f32 acc
    xq = jnp.dot(xn_b, wq_ref[...], preferred_element_type=f32)    # (B*S, D)
    xkv = jnp.dot(xn_b, wkv_ref[...], preferred_element_type=f32)  # (B*S, 2*DKV) = [K | V]

    # RoPE (reference quirk: applied to V as well).  2*DKV == D, so the K|V slab
    # reuses the per-head-periodic (B*S, D) tables — no lane slicing of tables.
    xq = _rope(xq, cos, sin_m, sin_p)
    xkv = _rope(xkv, cos, sin_m, sin_p)
    xkv_b = xkv.astype(bf16)

    scale = 1.0 / math.sqrt(HEAD_DIM)
    for b in range(BATCH):                                  # static unroll, tiny trip counts
        rows = slice(b * SEQ_LEN, (b + 1) * SEQ_LEN)
        for kv in range(N_KV_HEADS):
            h0 = kv * GROUP_SIZE                            # query heads sharing this KV head
            # stack the GROUP_SIZE query heads into one (G*S, hd) LHS -> 16 MXU rows
            q_pair = jnp.concatenate(
                [xq[rows, (h0 + g) * HEAD_DIM:(h0 + g + 1) * HEAD_DIM]
                 for g in range(GROUP_SIZE)], axis=0).astype(bf16)        # (G*S, hd)
            k_h = xkv_b[rows, kv * HEAD_DIM:(kv + 1) * HEAD_DIM]          # (S, hd)
            v_h = xkv_b[rows, DKV + kv * HEAD_DIM:DKV + (kv + 1) * HEAD_DIM]
            # q @ k^T via contract-last-dims dot_general (no materialized transpose)
            s = jax.lax.dot_general(q_pair, k_h, (((1,), (1,)), ((), ())),
                                    preferred_element_type=f32) * scale   # (G*S, S)
            s = s - jnp.max(s, axis=-1, keepdims=True)
            p = jnp.exp(s)
            p = p * pl.reciprocal(jnp.sum(p, axis=-1, keepdims=True), approx=True)
            o_pair = jnp.dot(p.astype(bf16), v_h, preferred_element_type=f32)  # (G*S, hd)
            for g in range(GROUP_SIZE):                     # static lane-offset stores,
                h = h0 + g                                  # no lane-dim concatenate
                attn_ref[rows, h * HEAD_DIM:(h + 1) * HEAD_DIM] = \
                    o_pair[g * SEQ_LEN:(g + 1) * SEQ_LEN]

    attn = jnp.dot(attn_ref[...].astype(bf16), wo_ref[...],
                   preferred_element_type=f32)              # out_proj, (B*S, D)
    h_res = x + attn

    # ------------------ feed-forward sub-block ------------------
    hn = _rms_norm(h_res, fnw_ref[...])                     # ffn_norm
    hn_b = hn.astype(bf16)
    a = jnp.dot(hn_b, w1_ref[...], preferred_element_type=f32)          # (B*S, HIDDEN)
    silu = a * jax.nn.sigmoid(a)
    ff = (jnp.dot(silu.astype(bf16), w2_ref[...], preferred_element_type=f32)
          + jnp.dot(hn_b, w3_ref[...], preferred_element_type=f32))
    o_ref[...] = (h_res + ff).astype(o_ref.dtype)


# -------------------------------- wrapper --------------------------------
@jax.jit
def encoder_block(x, rope_tab, params):
    anw, wq, wk, wv, wo, fnw, w1, w2, w3 = params
    B, S, D = x.shape
    assert (B, S, D) == (BATCH, SEQ_LEN, DIM)
    assert 2 * DKV == DIM, "K|V slab reuses the per-head-periodic (B*S, D) RoPE table"

    bf = lambda w: w.astype(jnp.bfloat16)          # bf16 MXU operands (f32 accumulation)
    wkv = jnp.concatenate([wk, wv], axis=1)        # fuse K/V projections -> one 128-wide matmul
    xf = x.reshape(B * S, D)                       # pack B*S rows into every projection

    inputs = (xf, rope_tab, anw, bf(wq), bf(wkv), bf(wo), fnw, bf(w1), bf(w2), bf(w3))

    # VMEM budget: all inputs + output + scratch ~0.4 MiB (<1 MiB with double
    # buffering), far under the 16/32 MiB scoped defaults and v7x's 64 MiB.
    # TODO(synk): at production DIM/HIDDEN, tile wq/wo/w1/w2/w3 along K/N with a
    # reduction grid axis and set vmem_limit_bytes (v7x's 64 MiB is the binding limit).
    def full_spec(a):
        nd = a.ndim
        return pl.BlockSpec(a.shape, lambda i, _nd=nd: (0,) * _nd)

    out = pl.pallas_call(
        encoder_block_kernel,
        out_shape=jax.ShapeDtypeStruct((B * S, D), jnp.float32),
        grid_spec=pltpu.PrefetchScalarGridSpec(
            num_scalar_prefetch=0,
            grid=(1,),                                      # batch collapsed: one invocation
            in_specs=[full_spec(a) for a in inputs],
            out_specs=pl.BlockSpec((B * S, D), lambda i: (0, 0)),
            scratch_shapes=[pltpu.VMEM((B * S, D), jnp.float32)],   # per-head attn outputs
        ),
        # single step; on v7x use grid=(B,) + ("parallel",) instead to engage both TCs
        compiler_params=pltpu.CompilerParams(dimension_semantics=("arbitrary",)),
    )(*inputs)
    return out.reshape(B, S, D)


# --------------------------- pure-JAX reference ---------------------------
def ref_encoder_block(x, cos, sin, params):
    anw, wq, wk, wv, wo, fnw, w1, w2, w3 = params
    B, S, D = x.shape

    def rms(t, w):
        ms = jnp.mean(t * t, axis=-1, keepdims=True)
        return w * (t * jnp.sqrt(ms + NORM_EPS))

    def rope4(t):  # t: (B, S, H, hd)
        t2 = t.reshape(*t.shape[:-1], -1, 2)
        a, b = t2[..., 0], t2[..., 1]
        c = cos[None, :, None, :]
        s = sin[None, :, None, :]
        return jnp.stack([a * c - b * s, a * s + b * c], axis=-1).reshape(t.shape)

    xn = rms(x, anw)
    xq = (xn @ wq).reshape(B, S, N_HEADS, HEAD_DIM)
    xk = (xn @ wk).reshape(B, S, N_KV_HEADS, HEAD_DIM)
    xv = (xn @ wv).reshape(B, S, N_KV_HEADS, HEAD_DIM)
    xq, xk, xv = rope4(xq), rope4(xk), rope4(xv)
    keys = jnp.repeat(xk, GROUP_SIZE, axis=2)
    vals = jnp.repeat(xv, GROUP_SIZE, axis=2)
    q, k, v = (t.transpose(0, 2, 1, 3) for t in (xq, keys, vals))
    scores = jnp.einsum('bhqd,bhkd->bhqk', q, k) / math.sqrt(HEAD_DIM)
    p = jax.nn.softmax(scores, axis=-1)
    o = jnp.einsum('bhqk,bhkd->bhqd', p, v).transpose(0, 2, 1, 3).reshape(B, S, D)
    h = x + o @ wo
    hn = rms(h, fnw)
    a = hn @ w1
    ff = (a * jax.nn.sigmoid(a)) @ w2 + hn @ w3
    return h + ff


# ---------------------------------- main ----------------------------------
if __name__ == "__main__":
    key = jax.random.PRNGKey(0)
    ks = jax.random.split(key, 9)

    x = jax.random.normal(ks[0], (BATCH, SEQ_LEN, DIM), jnp.float32)

    def init_w(k, din, dout):
        return jax.random.normal(k, (din, dout), jnp.float32) / math.sqrt(din)

    wq = init_w(ks[1], DIM, DIM)
    wk = init_w(ks[2], DIM, DKV)
    wv = init_w(ks[3], DIM, DKV)
    wo = init_w(ks[4], DIM, DIM)
    w1 = init_w(ks[5], DIM, HIDDEN)
    w2 = init_w(ks[6], HIDDEN, DIM)
    w3 = init_w(ks[7], DIM, DIM)
    anw = jnp.ones((1, DIM), jnp.float32)   # RMSNorm weight init = ones (as in module)
    fnw = jnp.ones((1, DIM), jnp.float32)
    params = (anw, wq, wk, wv, wo, fnw, w1, w2, w3)

    # rotary tables (start_pos = 0, positions 0..S-1)
    inv_freq = 1.0 / (ROPE_THETA ** (jnp.arange(0, HEAD_DIM, 2, dtype=jnp.float32) / HEAD_DIM))
    angles = jnp.arange(SEQ_LEN, dtype=jnp.float32)[:, None] * inv_freq[None, :]   # (S, hd/2)
    cos, sin = jnp.cos(angles), jnp.sin(angles)

    # kernel-side RoPE tables: sign baked in and masked to the lanes each roll
    # feeds, interleaved per pair, tiled per head (D) and per batch row -> (3, B*S, D)
    def interleave(a, b):               # a -> even lanes, b -> odd lanes
        return jnp.stack([a, b], axis=-1).reshape(a.shape[0], -1)

    zeros = jnp.zeros_like(sin)
    cos_h = interleave(cos, cos)                    # (S, hd)
    sinm_h = interleave(-sin, zeros)                # multiplies roll(t, -1)
    sinp_h = interleave(zeros, sin)                 # multiplies roll(t, +1)

    def per_row(tab):                               # tile heads across D, batches across rows
        return jnp.tile(jnp.tile(tab, (1, N_HEADS)), (BATCH, 1))

    rope_tab = jnp.stack([per_row(cos_h), per_row(sinm_h), per_row(sinp_h)], axis=0)

    out = jax.block_until_ready(encoder_block(x, rope_tab, params))

    ref = ref_encoder_block(x, cos, sin, params)
    err = float(jnp.max(jnp.abs(out - ref)))
    rel = err / float(jnp.max(jnp.abs(ref)))
    # bf16 matmul operands (f32 accumulation) + approx softmax reciprocal vs the
    # pure-f32 reference: allow 5% of the output dynamic range.
    assert out.shape == (BATCH, SEQ_LEN, DIM) and rel < 5e-2, f"max abs err {err} (rel {rel})"
    print("KERNEL_OK")
</pallas_src>

<mosaic_0001>
module attributes {stable_mosaic.version = 11 : i64} {
  func.func @encoder_block_kernel(%arg0: i32, %arg1: memref<16x128xf32, #tpu.memory_space<vmem>>, %arg2: memref<3x16x128xf32, #tpu.memory_space<vmem>>, %arg3: memref<1x128xf32, #tpu.memory_space<vmem>>, %arg4: memref<128x128xbf16, #tpu.memory_space<vmem>>, %arg5: memref<128x128xbf16, #tpu.memory_space<vmem>>, %arg6: memref<128x128xbf16, #tpu.memory_space<vmem>>, %arg7: memref<1x128xf32, #tpu.memory_space<vmem>>, %arg8: memref<128x384xbf16, #tpu.memory_space<vmem>>, %arg9: memref<384x128xbf16, #tpu.memory_space<vmem>>, %arg10: memref<128x128xbf16, #tpu.memory_space<vmem>>, %arg11: memref<16x128xf32, #tpu.memory_space<vmem>>, %arg12: memref<16x128xf32, #tpu.memory_space<vmem>>) attributes {dimension_semantics = [#tpu.dimension_semantics<arbitrary>], iteration_bounds = array<i64: 1>, scalar_prefetch = 0 : i64, scratch_operands = 1 : i64, tpu.core_type = #tpu.core_type<tc>, window_params = [{pipeline_mode = #tpu.pipeline_mode<synchronous>, transform_indices = @transform_0, window_bounds = array<i64: 16, 128>}, {pipeline_mode = #tpu.pipeline_mode<synchronous>, transform_indices = @transform_1, window_bounds = array<i64: 3, 16, 128>}, {pipeline_mode = #tpu.pipeline_mode<synchronous>, transform_indices = @transform_2, window_bounds = array<i64: 1, 128>}, {pipeline_mode = #tpu.pipeline_mode<synchronous>, transform_indices = @transform_3, window_bounds = array<i64: 128, 128>}, {pipeline_mode = #tpu.pipeline_mode<synchronous>, transform_indices = @transform_4, window_bounds = array<i64: 128, 128>}, {pipeline_mode = #tpu.pipeline_mode<synchronous>, transform_indices = @transform_5, window_bounds = array<i64: 128, 128>}, {pipeline_mode = #tpu.pipeline_mode<synchronous>, transform_indices = @transform_6, window_bounds = array<i64: 1, 128>}, {pipeline_mode = #tpu.pipeline_mode<synchronous>, transform_indices = @transform_7, window_bounds = array<i64: 128, 384>}, {pipeline_mode = #tpu.pipeline_mode<synchronous>, transform_indices = @transform_8, window_bounds = array<i64: 384, 128>}, {pipeline_mode = #tpu.pipeline_mode<synchronous>, transform_indices = @transform_9, window_bounds = array<i64: 128, 128>}, {pipeline_mode = #tpu.pipeline_mode<synchronous>, transform_indices = @transform_10, window_bounds = array<i64: 16, 128>}]} {
    %c0 = arith.constant 0 : index
    %c0_0 = arith.constant 0 : index
    %0 = vector.load %arg1[%c0, %c0_0] : memref<16x128xf32, #tpu.memory_space<vmem>>, vector<16x128xf32>
    %c0_1 = arith.constant 0 : index
    %c0_2 = arith.constant 0 : index
    %c0_3 = arith.constant 0 : index
    %1 = vector.load %arg2[%c0_1, %c0_2, %c0_3] : memref<3x16x128xf32, #tpu.memory_space<vmem>>, vector<1x16x128xf32>
    %2 = vector.shape_cast %1 : vector<1x16x128xf32> to vector<16x128xf32>
    %c1 = arith.constant 1 : index
    %c0_4 = arith.constant 0 : index
    %c0_5 = arith.constant 0 : index
    %3 = vector.load %arg2[%c1, %c0_4, %c0_5] : memref<3x16x128xf32, #tpu.memory_space<vmem>>, vector<1x16x128xf32>
    %4 = vector.shape_cast %3 : vector<1x16x128xf32> to vector<16x128xf32>
    %c2 = arith.constant 2 : index
    %c0_6 = arith.constant 0 : index
    %c0_7 = arith.constant 0 : index
    %5 = vector.load %arg2[%c2, %c0_6, %c0_7] : memref<3x16x128xf32, #tpu.memory_space<vmem>>, vector<1x16x128xf32>
    %6 = vector.shape_cast %5 : vector<1x16x128xf32> to vector<16x128xf32>
    %c0_8 = arith.constant 0 : index
    %c0_9 = arith.constant 0 : index
    %7 = vector.load %arg3[%c0_8, %c0_9] : memref<1x128xf32, #tpu.memory_space<vmem>>, vector<1x128xf32>
    %8 = arith.mulf %0, %0 : vector<16x128xf32>
    %cst = arith.constant dense<0.000000e+00> : vector<16xf32>
    %9 = vector.multi_reduction <add>, %8, %cst [1] : vector<16x128xf32> to vector<16xf32>
    %10 = vector.shape_cast %9 : vector<16xf32> to vector<16x1xf32>
    %cst_10 = arith.constant 1.280000e+02 : f32
    %11 = vector.broadcast %cst_10 : f32 to vector<16x1xf32>
    %12 = arith.divf %10, %11 : vector<16x1xf32>
    %cst_11 = arith.constant 9.99999974E-6 : f32
    %13 = vector.broadcast %cst_11 : f32 to vector<16x1xf32>
    %14 = arith.addf %12, %13 : vector<16x1xf32>
    %15 = math.sqrt %14 : vector<16x1xf32>
    %16 = vector.broadcast %15 : vector<16x1xf32> to vector<16x128xf32>
    %17 = arith.mulf %0, %16 : vector<16x128xf32>
    %18 = vector.broadcast %7 : vector<1x128xf32> to vector<16x128xf32>
    %19 = arith.mulf %18, %17 : vector<16x128xf32>
    %20 = arith.truncf %19 : vector<16x128xf32> to vector<16x128xbf16>
    %c0_12 = arith.constant 0 : index
    %c0_13 = arith.constant 0 : index
    %21 = vector.load %arg4[%c0_12, %c0_13] : memref<128x128xbf16, #tpu.memory_space<vmem>>, vector<128x128xbf16>
    %cst_14 = arith.constant dense<0.000000e+00> : vector<16x128xf32>
    %22 = tpu.matmul %20, %21, %cst_14 {dimension_numbers = #tpu.dot_dimension_numbers<[1], [0], [0], [1], [0, 0, 1, 1], [], []>} : vector<16x128xbf16>, vector<128x128xbf16>, vector<16x128xf32> -> vector<16x128xf32>
    %c0_15 = arith.constant 0 : index
    %c0_16 = arith.constant 0 : index
    %23 = vector.load %arg5[%c0_15, %c0_16] : memref<128x128xbf16, #tpu.memory_space<vmem>>, vector<128x128xbf16>
    %cst_17 = arith.constant dense<0.000000e+00> : vector<16x128xf32>
    %24 = tpu.matmul %20, %23, %cst_17 {dimension_numbers = #tpu.dot_dimension_numbers<[1], [0], [0], [1], [0, 0, 1, 1], [], []>} : vector<16x128xbf16>, vector<128x128xbf16>, vector<16x128xf32> -> vector<16x128xf32>
    %25 = arith.mulf %22, %2 : vector<16x128xf32>
    %c127_i32 = arith.constant 127 : i32
    %26 = tpu.dynamic_rotate %22 by %c127_i32 dim 1 : vector<16x128xf32>, i32 -> vector<16x128xf32>
    %27 = arith.mulf %26, %4 : vector<16x128xf32>
    %28 = arith.addf %25, %27 : vector<16x128xf32>
    %c1_i32 = arith.constant 1 : i32
    %29 = tpu.dynamic_rotate %22 by %c1_i32 dim 1 : vector<16x128xf32>, i32 -> vector<16x128xf32>
    %30 = arith.mulf %29, %6 : vector<16x128xf32>
    %31 = arith.addf %28, %30 : vector<16x128xf32>
    %32 = arith.mulf %24, %2 : vector<16x128xf32>
    %c127_i32_18 = arith.constant 127 : i32
    %33 = tpu.dynamic_rotate %24 by %c127_i32_18 dim 1 : vector<16x128xf32>, i32 -> vector<16x128xf32>
    %34 = arith.mulf %33, %4 : vector<16x128xf32>
    %35 = arith.addf %32, %34 : vector<16x128xf32>
    %c1_i32_19 = arith.constant 1 : i32
    %36 = tpu.dynamic_rotate %24 by %c1_i32_19 dim 1 : vector<16x128xf32>, i32 -> vector<16x128xf32>
    %37 = arith.mulf %36, %6 : vector<16x128xf32>
    %38 = arith.addf %35, %37 : vector<16x128xf32>
    %39 = arith.truncf %38 : vector<16x128xf32> to vector<16x128xbf16>
    %40 = vector.extract_strided_slice %31 {offsets = [0, 0], sizes = [8, 32], strides = [1, 1]} : vector<16x128xf32> to vector<8x32xf32>
    %41 = vector.extract_strided_slice %31 {offsets = [0, 32], sizes = [8, 32], strides = [1, 1]} : vector<16x128xf32> to vector<8x32xf32>
    %42 = tpu.concatenate %40, %41 in 0 : vector<8x32xf32>, vector<8x32xf32> -> vector<16x32xf32>
    %43 = arith.truncf %42 : vector<16x32xf32> to vector<16x32xbf16>
    %44 = vector.extract_strided_slice %39 {offsets = [0, 0], sizes = [8, 32], strides = [1, 1]} : vector<16x128xbf16> to vector<8x32xbf16>
    %45 = vector.extract_strided_slice %39 {offsets = [0, 64], sizes = [8, 32], strides = [1, 1]} : vector<16x128xbf16> to vector<8x32xbf16>
    %cst_20 = arith.constant dense<0.000000e+00> : vector<16x8xf32>
    %46 = tpu.matmul %43, %44, %cst_20 {dimension_numbers = #tpu.dot_dimension_numbers<[1], [1], [0], [0], [0, 0, 1, 0], [], []>} : vector<16x32xbf16>, vector<8x32xbf16>, vector<16x8xf32> -> vector<16x8xf32>
    %cst_21 = arith.constant 0.176776692 : f32
    %47 = vector.broadcast %cst_21 : f32 to vector<16x8xf32>
    %48 = arith.mulf %46, %47 : vector<16x8xf32>
    %cst_22 = arith.constant dense<0xFF800000> : vector<16xf32>
    %49 = vector.multi_reduction <maximumf>, %48, %cst_22 [1] : vector<16x8xf32> to vector<16xf32>
    %50 = vector.shape_cast %49 : vector<16xf32> to vector<16x1xf32>
    %51 = vector.broadcast %50 : vector<16x1xf32> to vector<16x8xf32>
    %52 = arith.subf %48, %51 : vector<16x8xf32>
    %53 = math.exp %52 : vector<16x8xf32>
    %cst_23 = arith.constant dense<0.000000e+00> : vector<16xf32>
    %54 = vector.multi_reduction <add>, %53, %cst_23 [1] : vector<16x8xf32> to vector<16xf32>
    %55 = vector.shape_cast %54 : vector<16xf32> to vector<16x1xf32>
    %56 = tpu.reciprocal %55 {approx = true} : vector<16x1xf32> -> vector<16x1xf32>
    %57 = vector.broadcast %56 : vector<16x1xf32> to vector<16x8xf32>
    %58 = arith.mulf %53, %57 : vector<16x8xf32>
    %59 = arith.truncf %58 : vector<16x8xf32> to vector<16x8xbf16>
    %cst_24 = arith.constant dense<0.000000e+00> : vector<16x32xf32>
    %60 = tpu.matmul %59, %45, %cst_24 {dimension_numbers = #tpu.dot_dimension_numbers<[1], [0], [0], [1], [0, 0, 1, 1], [], []>} : vector<16x8xbf16>, vector<8x32xbf16>, vector<16x32xf32> -> vector<16x32xf32>
    %61 = vector.extract_strided_slice %60 {offsets = [0, 0], sizes = [8, 32], strides = [1, 1]} : vector<16x32xf32> to vector<8x32xf32>
    %c0_25 = arith.constant 0 : index
    %c0_26 = arith.constant 0 : index
    %62 = vector.load %arg12[%c0_25, %c0_26] : memref<16x128xf32, #tpu.memory_space<vmem>>, vector<8x32xf32>
    tpu.vector_store %arg12[%c0_25, %c0_26], %61 {strides = array<i32>} : memref<16x128xf32, #tpu.memory_space<vmem>>, vector<8x32xf32>,
    %63 = vector.extract_strided_slice %60 {offsets = [8, 0], sizes = [8, 32], strides = [1, 1]} : vector<16x32xf32> to vector<8x32xf32>
    %c0_27 = arith.constant 0 : index
    %c32 = arith.constant 32 : index
    %64 = vector.load %arg12[%c0_27, %c32] : memref<16x128xf32, #tpu.memory_space<vmem>>, vector<8x32xf32>
    tpu.vector_store %arg12[%c0_27, %c32], %63 {strides = array<i32>} : memref<16x128xf32, #tpu.memory_space<vmem>>, vector<8x32xf32>,
    %65 = vector.extract_strided_slice %31 {offsets = [0, 64], sizes = [8, 32], strides = [1, 1]} : vector<16x128xf32> to vector<8x32xf32>
    %66 = vector.extract_strided_slice %31 {offsets = [0, 96], sizes = [8, 32], strides = [1, 1]} : vector<16x128xf32> to vector<8x32xf32>
    %67 = tpu.concatenate %65, %66 in 0 : vector<8x32xf32>, vector<8x32xf32> -> vector<16x32xf32>
    %68 = arith.truncf %67 : vector<16x32xf32> to vector<16x32xbf16>
    %69 = vector.extract_strided_slice %39 {offsets = [0, 32], sizes = [8, 32], strides = [1, 1]} : vector<16x128xbf16> to vector<8x32xbf16>
    %70 = vector.extract_strided_slice %39 {offsets = [0, 96], sizes = [8, 32], strides = [1, 1]} : vector<16x128xbf16> to vector<8x32xbf16>
    %cst_28 = arith.constant dense<0.000000e+00> : vector<16x8xf32>
    %71 = tpu.matmul %68, %69, %cst_28 {dimension_numbers = #tpu.dot_dimension_numbers<[1], [1], [0], [0], [0, 0, 1, 0], [], []>} : vector<16x32xbf16>, vector<8x32xbf16>, vector<16x8xf32> -> vector<16x8xf32>
    %cst_29 = arith.constant 0.176776692 : f32
    %72 = vector.broadcast %cst_29 : f32 to vector<16x8xf32>
    %73 = arith.mulf %71, %72 : vector<16x8xf32>
    %cst_30 = arith.constant dense<0xFF800000> : vector<16xf32>
    %74 = vector.multi_reduction <maximumf>, %73, %cst_30 [1] : vector<16x8xf32> to vector<16xf32>
    %75 = vector.shape_cast %74 : vector<16xf32> to vector<16x1xf32>
    %76 = vector.broadcast %75 : vector<16x1xf32> to vector<16x8xf32>
    %77 = arith.subf %73, %76 : vector<16x8xf32>
    %78 = math.exp %77 : vector<16x8xf32>
    %cst_31 = arith.constant dense<0.000000e+00> : vector<16xf32>
    %79 = vector.multi_reduction <add>, %78, %cst_31 [1] : vector<16x8xf32> to vector<16xf32>
    %80 = vector.shape_cast %79 : vector<16xf32> to vector<16x1xf32>
    %81 = tpu.reciprocal %80 {approx = true} : vector<16x1xf32> -> vector<16x1xf32>
    %82 = vector.broadcast %81 : vector<16x1xf32> to vector<16x8xf32>
    %83 = arith.mulf %78, %82 : vector<16x8xf32>
    %84 = arith.truncf %83 : vector<16x8xf32> to vector<16x8xbf16>
    %cst_32 = arith.constant dense<0.000000e+00> : vector<16x32xf32>
    %85 = tpu.matmul %84, %70, %cst_32 {dimension_numbers = #tpu.dot_dimension_numbers<[1], [0], [0], [1], [0, 0, 1, 1], [], []>} : vector<16x8xbf16>, vector<8x32xbf16>, vector<16x32xf32> -> vector<16x32xf32>
    %86 = vector.extract_strided_slice %85 {offsets = [0, 0], sizes = [8, 32], strides = [1, 1]} : vector<16x32xf32> to vector<8x32xf32>
    %c0_33 = arith.constant 0 : index
    %c64 = arith.constant 64 : index
    %87 = vector.load %arg12[%c0_33, %c64] : memref<16x128xf32, #tpu.memory_space<vmem>>, vector<8x32xf32>
    tpu.vector_store %arg12[%c0_33, %c64], %86 {strides = array<i32>} : memref<16x128xf32, #tpu.memory_space<vmem>>, vector<8x32xf32>,
    %88 = vector.extract_strided_slice %85 {offsets = [8, 0], sizes = [8, 32], strides = [1, 1]} : vector<16x32xf32> to vector<8x32xf32>
    %c0_34 = arith.constant 0 : index
    %c96 = arith.constant 96 : index
    %89 = vector.load %arg12[%c0_34, %c96] : memref<16x128xf32, #tpu.memory_space<vmem>>, vector<8x32xf32>
    tpu.vector_store %arg12[%c0_34, %c96], %88 {strides = array<i32>} : memref<16x128xf32, #tpu.memory_space<vmem>>, vector<8x32xf32>,
    %90 = vector.extract_strided_slice %31 {offsets = [8, 0], sizes = [8, 32], strides = [1, 1]} : vector<16x128xf32> to vector<8x32xf32>
    %91 = vector.extract_strided_slice %31 {offsets = [8, 32], sizes = [8, 32], strides = [1, 1]} : vector<16x128xf32> to vector<8x32xf32>
    %92 = tpu.concatenate %90, %91 in 0 : vector<8x32xf32>, vector<8x32xf32> -> vector<16x32xf32>
    %93 = arith.truncf %92 : vector<16x32xf32> to vector<16x32xbf16>
    %94 = vector.extract_strided_slice %39 {offsets = [8, 0], sizes = [8, 32], strides = [1, 1]} : vector<16x128xbf16> to vector<8x32xbf16>
    %95 = vector.extract_strided_slice %39 {offsets = [8, 64], sizes = [8, 32], strides = [1, 1]} : vector<16x128xbf16> to vector<8x32xbf16>
    %cst_35 = arith.constant dense<0.000000e+00> : vector<16x8xf32>
    %96 = tpu.matmul %93, %94, %cst_35 {dimension_numbers = #tpu.dot_dimension_numbers<[1], [1], [0], [0], [0, 0, 1, 0], [], []>} : vector<16x32xbf16>, vector<8x32xbf16>, vector<16x8xf32> -> vector<16x8xf32>
    %cst_36 = arith.constant 0.176776692 : f32
    %97 = vector.broadcast %cst_36 : f32 to vector<16x8xf32>
    %98 = arith.mulf %96, %97 : vector<16x8xf32>
    %cst_37 = arith.constant dense<0xFF800000> : vector<16xf32>
    %99 = vector.multi_reduction <maximumf>, %98, %cst_37 [1] : vector<16x8xf32> to vector<16xf32>
    %100 = vector.shape_cast %99 : vector<16xf32> to vector<16x1xf32>
    %101 = vector.broadcast %100 : vector<16x1xf32> to vector<16x8xf32>
    %102 = arith.subf %98, %101 : vector<16x8xf32>
    %103 = math.exp %102 : vector<16x8xf32>
    %cst_38 = arith.constant dense<0.000000e+00> : vector<16xf32>
    %104 = vector.multi_reduction <add>, %103, %cst_38 [1] : vector<16x8xf32> to vector<16xf32>
    %105 = vector.shape_cast %104 : vector<16xf32> to vector<16x1xf32>
    %106 = tpu.reciprocal %105 {approx = true} : vector<16x1xf32> -> vector<16x1xf32>
    %107 = vector.broadcast %106 : vector<16x1xf32> to vector<16x8xf32>
    %108 = arith.mulf %103, %107 : vector<16x8xf32>
    %109 = arith.truncf %108 : vector<16x8xf32> to vector<16x8xbf16>
    %cst_39 = arith.constant dense<0.000000e+00> : vector<16x32xf32>
    %110 = tpu.matmul %109, %95, %cst_39 {dimension_numbers = #tpu.dot_dimension_numbers<[1], [0], [0], [1], [0, 0, 1, 1], [], []>} : vector<16x8xbf16>, vector<8x32xbf16>, vector<16x32xf32> -> vector<16x32xf32>
    %111 = vector.extract_strided_slice %110 {offsets = [0, 0], sizes = [8, 32], strides = [1, 1]} : vector<16x32xf32> to vector<8x32xf32>
    %c8 = arith.constant 8 : index
    %c0_40 = arith.constant 0 : index
    %112 = vector.load %arg12[%c8, %c0_40] : memref<16x128xf32, #tpu.memory_space<vmem>>, vector<8x32xf32>
    tpu.vector_store %arg12[%c8, %c0_40], %111 {strides = array<i32>} : memref<16x128xf32, #tpu.memory_space<vmem>>, vector<8x32xf32>,
    %113 = vector.extract_strided_slice %110 {offsets = [8, 0], sizes = [8, 32], strides = [1, 1]} : vector<16x32xf32> to vector<8x32xf32>
    %c8_41 = arith.constant 8 : index
    %c32_42 = arith.constant 32 : index
    %114 = vector.load %arg12[%c8_41, %c32_42] : memref<16x128xf32, #tpu.memory_space<vmem>>, vector<8x32xf32>
    tpu.vector_store %arg12[%c8_41, %c32_42], %113 {strides = array<i32>} : memref<16x128xf32, #tpu.memory_space<vmem>>, vector<8x32xf32>,
    %115 = vector.extract_strided_slice %31 {offsets = [8, 64], sizes = [8, 32], strides = [1, 1]} : vector<16x128xf32> to vector<8x32xf32>
    %116 = vector.extract_strided_slice %31 {offsets = [8, 96], sizes = [8, 32], strides = [1, 1]} : vector<16x128xf32> to vector<8x32xf32>
    %117 = tpu.concatenate %115, %116 in 0 : vector<8x32xf32>, vector<8x32xf32> -> vector<16x32xf32>
    %118 = arith.truncf %117 : vector<16x32xf32> to vector<16x32xbf16>
    %119 = vector.extract_strided_slice %39 {offsets = [8, 32], sizes = [8, 32], strides = [1, 1]} : vector<16x128xbf16> to vector<8x32xbf16>
    %120 = vector.extract_strided_slice %39 {offsets = [8, 96], sizes = [8, 32], strides = [1, 1]} : vector<16x128xbf16> to vector<8x32xbf16>
    %cst_43 = arith.constant dense<0.000000e+00> : vector<16x8xf32>
    %121 = tpu.matmul %118, %119, %cst_43 {dimension_numbers = #tpu.dot_dimension_numbers<[1], [1], [0], [0], [0, 0, 1, 0], [], []>} : vector<16x32xbf16>, vector<8x32xbf16>, vector<16x8xf32> -> vector<16x8xf32>
    %cst_44 = arith.constant 0.176776692 : f32
    %122 = vector.broadcast %cst_44 : f32 to vector<16x8xf32>
    %123 = arith.mulf %121, %122 : vector<16x8xf32>
    %cst_45 = arith.constant dense<0xFF800000> : vector<16xf32>
    %124 = vector.multi_reduction <maximumf>, %123, %cst_45 [1] : vector<16x8xf32> to vector<16xf32>
    %125 = vector.shape_cast %124 : vector<16xf32> to vector<16x1xf32>
    %126 = vector.broadcast %125 : vector<16x1xf32> to vector<16x8xf32>
    %127 = arith.subf %123, %126 : vector<16x8xf32>
    %128 = math.exp %127 : vector<16x8xf32>
    %cst_46 = arith.constant dense<0.000000e+00> : vector<16xf32>
    %129 = vector.multi_reduction <add>, %128, %cst_46 [1] : vector<16x8xf32> to vector<16xf32>
    %130 = vector.shape_cast %129 : vector<16xf32> to vector<16x1xf32>
    %131 = tpu.reciprocal %130 {approx = true} : vector<16x1xf32> -> vector<16x1xf32>
    %132 = vector.broadcast %131 : vector<16x1xf32> to vector<16x8xf32>
    %133 = arith.mulf %128, %132 : vector<16x8xf32>
    %134 = arith.truncf %133 : vector<16x8xf32> to vector<16x8xbf16>
    %cst_47 = arith.constant dense<0.000000e+00> : vector<16x32xf32>
    %135 = tpu.matmul %134, %120, %cst_47 {dimension_numbers = #tpu.dot_dimension_numbers<[1], [0], [0], [1], [0, 0, 1, 1], [], []>} : vector<16x8xbf16>, vector<8x32xbf16>, vector<16x32xf32> -> vector<16x32xf32>
    %136 = vector.extract_strided_slice %135 {offsets = [0, 0], sizes = [8, 32], strides = [1, 1]} : vector<16x32xf32> to vector<8x32xf32>
    %c8_48 = arith.constant 8 : index
    %c64_49 = arith.constant 64 : index
    %137 = vector.load %arg12[%c8_48, %c64_49] : memref<16x128xf32, #tpu.memory_space<vmem>>, vector<8x32xf32>
    tpu.vector_store %arg12[%c8_48, %c64_49], %136 {strides = array<i32>} : memref<16x128xf32, #tpu.memory_space<vmem>>, vector<8x32xf32>,
    %138 = vector.extract_strided_slice %135 {offsets = [8, 0], sizes = [8, 32], strides = [1, 1]} : vector<16x32xf32> to vector<8x32xf32>
    %c8_50 = arith.constant 8 : index
    %c96_51 = arith.constant 96 : index
    %139 = vector.load %arg12[%c8_50, %c96_51] : memref<16x128xf32, #tpu.memory_space<vmem>>, vector<8x32xf32>
    tpu.vector_store %arg12[%c8_50, %c96_51], %138 {strides = array<i32>} : memref<16x128xf32, #tpu.memory_space<vmem>>, vector<8x32xf32>,
    %c0_52 = arith.constant 0 : index
    %c0_53 = arith.constant 0 : index
    %140 = vector.load %arg12[%c0_52, %c0_53] : memref<16x128xf32, #tpu.memory_space<vmem>>, vector<16x128xf32>
    %141 = arith.truncf %140 : vector<16x128xf32> to vector<16x128xbf16>
    %c0_54 = arith.constant 0 : index
    %c0_55 = arith.constant 0 : index
    %142 = vector.load %arg6[%c0_54, %c0_55] : memref<128x128xbf16, #tpu.memory_space<vmem>>, vector<128x128xbf16>
    %cst_56 = arith.constant dense<0.000000e+00> : vector<16x128xf32>
    %143 = tpu.matmul %141, %142, %cst_56 {dimension_numbers = #tpu.dot_dimension_numbers<[1], [0], [0], [1], [0, 0, 1, 1], [], []>} : vector<16x128xbf16>, vector<128x128xbf16>, vector<16x128xf32> -> vector<16x128xf32>
    %144 = arith.addf %0, %143 : vector<16x128xf32>
    %c0_57 = arith.constant 0 : index
    %c0_58 = arith.constant 0 : index
    %145 = vector.load %arg7[%c0_57, %c0_58] : memref<1x128xf32, #tpu.memory_space<vmem>>, vector<1x128xf32>
    %146 = arith.mulf %144, %144 : vector<16x128xf32>
    %cst_59 = arith.constant dense<0.000000e+00> : vector<16xf32>
    %147 = vector.multi_reduction <add>, %146, %cst_59 [1] : vector<16x128xf32> to vector<16xf32>
    %148 = vector.shape_cast %147 : vector<16xf32> to vector<16x1xf32>
    %cst_60 = arith.constant 1.280000e+02 : f32
    %149 = vector.broadcast %cst_60 : f32 to vector<16x1xf32>
    %150 = arith.divf %148, %149 : vector<16x1xf32>
    %cst_61 = arith.constant 9.99999974E-6 : f32
    %151 = vector.broadcast %cst_61 : f32 to vector<16x1xf32>
    %152 = arith.addf %150, %151 : vector<16x1xf32>
    %153 = math.sqrt %152 : vector<16x1xf32>
    %154 = vector.broadcast %153 : vector<16x1xf32> to vector<16x128xf32>
    %155 = arith.mulf %144, %154 : vector<16x128xf32>
    %156 = vector.broadcast %145 : vector<1x128xf32> to vector<16x128xf32>
    %157 = arith.mulf %156, %155 : vector<16x128xf32>
    %158 = arith.truncf %157 : vector<16x128xf32> to vector<16x128xbf16>
    %c0_62 = arith.constant 0 : index
    %c0_63 = arith.constant 0 : index
    %159 = vector.load %arg8[%c0_62, %c0_63] : memref<128x384xbf16, #tpu.memory_space<vmem>>, vector<128x384xbf16>
    %cst_64 = arith.constant dense<0.000000e+00> : vector<16x384xf32>
    %160 = tpu.matmul %158, %159, %cst_64 {dimension_numbers = #tpu.dot_dimension_numbers<[1], [0], [0], [1], [0, 0, 1, 1], [], []>} : vector<16x128xbf16>, vector<128x384xbf16>, vector<16x384xf32> -> vector<16x384xf32>
    %161 = arith.negf %160 : vector<16x384xf32>
    %162 = math.exp %161 : vector<16x384xf32>
    %cst_65 = arith.constant 1.000000e+00 : f32
    %163 = vector.broadcast %cst_65 : f32 to vector<16x384xf32>
    %164 = arith.addf %163, %162 : vector<16x384xf32>
    %165 = arith.divf %163, %164 : vector<16x384xf32>
    %166 = arith.mulf %160, %165 : vector<16x384xf32>
    %167 = arith.truncf %166 : vector<16x384xf32> to vector<16x384xbf16>
    %c0_66 = arith.constant 0 : index
    %c0_67 = arith.constant 0 : index
    %168 = vector.load %arg9[%c0_66, %c0_67] : memref<384x128xbf16, #tpu.memory_space<vmem>>, vector<384x128xbf16>
    %cst_68 = arith.constant dense<0.000000e+00> : vector<16x128xf32>
    %169 = tpu.matmul %167, %168, %cst_68 {dimension_numbers = #tpu.dot_dimension_numbers<[1], [0], [0], [1], [0, 0, 1, 1], [], []>} : vector<16x384xbf16>, vector<384x128xbf16>, vector<16x128xf32> -> vector<16x128xf32>
    %c0_69 = arith.constant 0 : index
    %c0_70 = arith.constant 0 : index
    %170 = vector.load %arg10[%c0_69, %c0_70] : memref<128x128xbf16, #tpu.memory_space<vmem>>, vector<128x128xbf16>
    %cst_71 = arith.constant dense<0.000000e+00> : vector<16x128xf32>
    %171 = tpu.matmul %158, %170, %cst_71 {dimension_numbers = #tpu.dot_dimension_numbers<[1], [0], [0], [1], [0, 0, 1, 1], [], []>} : vector<16x128xbf16>, vector<128x128xbf16>, vector<16x128xf32> -> vector<16x128xf32>
    %172 = arith.addf %169, %171 : vector<16x128xf32>
    %173 = arith.addf %144, %172 : vector<16x128xf32>
    %c0_72 = arith.constant 0 : index
    %c0_73 = arith.constant 0 : index
    %174 = vector.load %arg11[%c0_72, %c0_73] : memref<16x128xf32, #tpu.memory_space<vmem>>, vector<16x128xf32>
    tpu.vector_store %arg11[%c0_72, %c0_73], %173 {strides = array<i32>} : memref<16x128xf32, #tpu.memory_space<vmem>>, vector<16x128xf32>,
    return
  }
  func.func @transform_0(%arg0: i32) -> (i32, i32) {
    %c0_i32 = arith.constant 0 : i32
    %c0_i32_0 = arith.constant 0 : i32
    %c0_i32_1 = arith.constant 0 : i32
    return %c0_i32, %c0_i32_0 : i32, i32
  }
  func.func @transform_1(%arg0: i32) -> (i32, i32, i32) {
    %c0_i32 = arith.constant 0 : i32
    %c0_i32_0 = arith.constant 0 : i32
    %c0_i32_1 = arith.constant 0 : i32
    %c0_i32_2 = arith.constant 0 : i32
    return %c0_i32, %c0_i32_0, %c0_i32_1 : i32, i32, i32
  }
  func.func @transform_2(%arg0: i32) -> (i32, i32) {
    %c0_i32 = arith.constant 0 : i32
    %c0_i32_0 = arith.constant 0 : i32
    %c0_i32_1 = arith.constant 0 : i32
    return %c0_i32, %c0_i32_0 : i32, i32
  }
  func.func @transform_3(%arg0: i32) -> (i32, i32) {
    %c0_i32 = arith.constant 0 : i32
    %c0_i32_0 = arith.constant 0 : i32
    %c0_i32_1 = arith.constant 0 : i32
    return %c0_i32, %c0_i32_0 : i32, i32
  }
  func.func @transform_4(%arg0: i32) -> (i32, i32) {
    %c0_i32 = arith.constant 0 : i32
    %c0_i32_0 = arith.constant 0 : i32
    %c0_i32_1 = arith.constant 0 : i32
    return %c0_i32, %c0_i32_0 : i32, i32
  }
  func.func @transform_5(%arg0: i32) -> (i32, i32) {
    %c0_i32 = arith.constant 0 : i32
    %c0_i32_0 = arith.constant 0 : i32
    %c0_i32_1 = arith.constant 0 : i32
    return %c0_i32, %c0_i32_0 : i32, i32
  }
  func.func @transform_6(%arg0: i32) -> (i32, i32) {
    %c0_i32 = arith.constant 0 : i32
    %c0_i32_0 = arith.constant 0 : i32
    %c0_i32_1 = arith.constant 0 : i32
    return %c0_i32, %c0_i32_0 : i32, i32
  }
  func.func @transform_7(%arg0: i32) -> (i32, i32) {
    %c0_i32 = arith.constant 0 : i32
    %c0_i32_0 = arith.constant 0 : i32
    %c0_i32_1 = arith.constant 0 : i32
    return %c0_i32, %c0_i32_0 : i32, i32
  }
  func.func @transform_8(%arg0: i32) -> (i32, i32) {
    %c0_i32 = arith.constant 0 : i32
    %c0_i32_0 = arith.constant 0 : i32
    %c0_i32_1 = arith.constant 0 : i32
    return %c0_i32, %c0_i32_0 : i32, i32
  }
  func.func @transform_9(%arg0: i32) -> (i32, i32) {
    %c0_i32 = arith.constant 0 : i32
    %c0_i32_0 = arith.constant 0 : i32
    %c0_i32_1 = arith.constant 0 : i32
    return %c0_i32, %c0_i32_0 : i32, i32
  }
  func.func @transform_10(%arg0: i32) -> (i32, i32) {
    %c0_i32 = arith.constant 0 : i32
    %c0_i32_0 = arith.constant 0 : i32
    %c0_i32_1 = arith.constant 0 : i32
    return %c0_i32, %c0_i32_0 : i32, i32
  }
}

</mosaic_0001>

<bundles_post_ra>
// kernel: encoder_block.1
= control target key start
LH: loop header
LB: loop body
LE: loop exit
PB: predicated region body
PF: predicated region fallthrough
CT: control target
= control target key end

     0   :  { %v2256_v6 = vmov 0.0   ;;  %vm2257_vm0 = vmmov 0   ;;  %s2786_s0 = inlined_call_operand.vmem [shape: f32[16,128], index: 0, kind: input, shape index: {}]   ;;  %s2787_s1 = inlined_call_operand.vmem [shape: f32[3,16,128], index: 1, kind: input, shape index: {}]   ;;  %s2788_s2 = inlined_call_operand.vmem [shape: f32[1,128], index: 2, kind: input, shape index: {}]   ;;  %s2789_s3 = inlined_call_operand.vmem [shape: bf16[128,128], index: 3, kind: input, shape index: {}]   ;;  %s2790_s4 = inlined_call_operand.vmem [shape: bf16[128,128], index: 4, kind: input, shape index: {}]   ;;  %s2791_s5 = inlined_call_operand.vmem [shape: bf16[128,128], index: 5, kind: input, shape index: {}]   ;;  %s2792_s6 = inlined_call_operand.vmem [shape: f32[1,128], index: 6, kind: input, shape index: {}]   ;;  %s2793_s7 = inlined_call_operand.vmem [shape: bf16[128,384], index: 7, kind: input, shape index: {}]   ;;  %s2794_s8 = inlined_call_operand.vmem [shape: bf16[384,128], index: 8, kind: input, shape index: {}]   ;;  %s2795_s9 = inlined_call_operand.vmem [shape: bf16[128,128], index: 9, kind: input, shape index: {}]   ;;  %s2796_s10 = inlined_call_operand.hbm [shape: f32[16,128], index: 10, kind: output, shape index: {}]  }
   0x1   :  { %v2325_v0 = vld [vmem:[%s2786_s0] sm:$0xff]  ;;  %v2330_v1 = vld [vmem:[%s2786_s0 + $0x8] sm:$0xff]  ;;  %v2080_v4 = vld [vmem:[%s2789_s3 + $0x38] sm:$0xff]   ;;  %1901 = vmatprep.subr.bf16.mxu0 %v2256_v6  ;;  %1921 = vmatprep.subr.bf16.mxu1 %v2256_v6 }
   0x2   :  { %v48_v2 = vmul.f32 %v2325_v0, %v2325_v0  ;;  %v49_v3 = vmul.f32 %v2330_v1, %v2330_v1  ;;  %v2081_v5 = vld [vmem:[%s2790_s4 + $0x38] sm:$0xff]   ;;  %1902 = vmatpush3.bf16.msra.mxu0 %v2080_v4  ;;  %v2082_v7 = vld [vmem:[%s2789_s3 + $0x30] sm:$0xff]   ;;  %v2084_v9 = vld [vmem:[%s2789_s3 + $0x28] sm:$0xff]   ;;  %1917 = vmatprep.mubr.msk.bf16.mxu0 %vm2257_vm0, %v2256_v6 }
   0x3   :  { %1922 = vmatpush3.bf16.msra.mxu1 %v2081_v5  ;;  %1903 = vmatprep.subr.bf16.mxu0 %v2256_v6  ;;  %v2083_v8 = vld [vmem:[%s2790_s4 + $0x30] sm:$0xff]   ;;  %v2085_v10 = vld [vmem:[%s2790_s4 + $0x28] sm:$0xff]   ;;  %v2086_v11 = vld [vmem:[%s2789_s3 + $0x20] sm:$0xff]  }
   0x4   :  { %50 = vadd.xlane.f32.xlu0 %v48_v2  ;;  %1923 = vmatprep.subr.bf16.mxu1 %v2256_v6  ;;  %v2087_v12 = vld [vmem:[%s2790_s4 + $0x20] sm:$0xff]   ;;  %v2088_v13 = vld [vmem:[%s2789_s3 + $0x18] sm:$0xff]   ;;  %v2090_v15 = vld [vmem:[%s2789_s3 + $0x10] sm:$0xff]  }
   0x5   :  { %v2089_v14 = vld [vmem:[%s2790_s4 + $0x18] sm:$0xff]   ;;  %1937 = vmatprep.mubr.msk.bf16.mxu1 %vm2257_vm0, %v2256_v6  ;;  %v2091_v16 = vld [vmem:[%s2790_s4 + $0x10] sm:$0xff]   ;;  %v2092_v17 = vld [vmem:[%s2789_s3 + $0x8] sm:$0xff]  }
   0x6   :  { %1904 = vmatpush3.bf16.msra.mxu0 %v2082_v7  ;;  %v2093_v18 = vld [vmem:[%s2790_s4 + $0x8] sm:$0xff]   ;;  %v2094_v19 = vld [vmem:[%s2789_s3] sm:$0xff]  }
   0x7   :  { %1924 = vmatpush3.bf16.msra.mxu1 %v2083_v8  ;;  %1905 = vmatprep.subr.bf16.mxu0 %v2256_v6  ;;  %v2095_v20 = vld [vmem:[%s2790_s4] sm:$0xff]  }
   0x8   :  { %52 = vadd.xlane.f32.xlu0 %v49_v3  ;;  %1925 = vmatprep.subr.bf16.mxu1 %v2256_v6 }
   0xa   :  { %1906 = vmatpush3.bf16.msra.mxu0 %v2084_v9 }
   0xb   :  { %1926 = vmatpush3.bf16.msra.mxu1 %v2085_v10  ;;  %1907 = vmatprep.subr.bf16.mxu0 %v2256_v6 }
   0xc   :  { %1927 = vmatprep.subr.bf16.mxu1 %v2256_v6 }
   0xe   :  { %1908 = vmatpush3.bf16.msra.mxu0 %v2086_v11 }
   0xf   :  { %1928 = vmatpush3.bf16.msra.mxu1 %v2087_v12  ;;  %1909 = vmatprep.subr.bf16.mxu0 %v2256_v6 }
  0x10   :  { %1929 = vmatprep.subr.bf16.mxu1 %v2256_v6 }
  0x12   :  { %1910 = vmatpush3.bf16.msra.mxu0 %v2088_v13 }
  0x13   :  { %1930 = vmatpush3.bf16.msra.mxu1 %v2089_v14  ;;  %1911 = vmatprep.subr.bf16.mxu0 %v2256_v6 }
  0x14   :  { %1931 = vmatprep.subr.bf16.mxu1 %v2256_v6 }
  0x16   :  { %1912 = vmatpush3.bf16.msra.mxu0 %v2090_v15 }
  0x17   :  { %1932 = vmatpush3.bf16.msra.mxu1 %v2091_v16  ;;  %1913 = vmatprep.subr.bf16.mxu0 %v2256_v6 }
  0x18   :  { %1933 = vmatprep.subr.bf16.mxu1 %v2256_v6 }
  0x1a   :  { %1914 = vmatpush3.bf16.msra.mxu0 %v2092_v17 }
  0x1b   :  { %1934 = vmatpush3.bf16.msra.mxu1 %v2093_v18  ;;  %1915 = vmatprep.subr.bf16.mxu0 %v2256_v6 }
  0x1c   :  { %1935 = vmatprep.subr.bf16.mxu1 %v2256_v6 }
  0x1e   :  { %1916 = vmatpush3.bf16.msra.mxu0 %v2094_v19 }
  0x1f   :  { %1936 = vmatpush3.bf16.msra.mxu1 %v2095_v20  ;;  %1941 = vmatprep.subr.bf16.mxu0 %v2256_v6 }
  0x20   :  { %1947 = vmatprep.subr.bf16.mxu1 %v2256_v6 }
  0x21   :  { %15 = vsyncpa [#allocation4], 0  ;;  %v1713_v37 = vld [vmem:[%s2788_s2] ss:$0 sm:$0xff]  ;;  %s2258_s29 = smov 127   ;;  %s2259_s2 = smov 1  }
  0x22   :  { %v1709_v51 = vld [vmem:[%s2787_s1 + $0x10] sm:$0xff]  ;;  %v39_v52 = vld [vmem:[%s2787_s1] sm:$0xff]  ;;  %v1710_v56 = vld [vmem:[%s2787_s1 + $0x18] sm:$0xff]  ;;  %s2260_s22 = smov 96   ;;  %vm336_vm5 = vcmask 261120   ;;  %vm386_vm6 = vcmask 64512  }
  0x23   :  { %v1711_v55 = vld [vmem:[%s2787_s1 + $0x20] sm:$0xff]  ;;  %v40_v58 = vld [vmem:[%s2787_s1 + $0x8] sm:$0xff]  ;;  %s2262_s23 = smov 32   ;;  %vm416_vm7 = vcmask 1043456   ;;  %vm466_vm8 = vcmask 523520   ;;  %vm598_vm9 = vcmask 785920  }
  0x24   :  { %vm604_vm10 = vcmask 1048320  }
  0x8d   :  { %v51_v21 = vpop.xlane.xlu0 %50 }
  0x8e   :  { %v55_v22 = vmul.f32 0.0078125, %v51_v21 }
  0x90   :  { %v57_v23 = vadd.f32 1e-05, %v55_v22 }
  0x91   :  { %v53_v24 = vpop.xlane.xlu0 %52 }
  0x92   :  { %2168 = vrsqrt.f32 %v57_v23  ;;  %v56_v25 = vmul.f32 0.0078125, %v53_v24  ;;  %vm61_vm1 = vcmp.eq.f32.partialorder %v57_v23, inf  ;;  %v64_v29 = vand.u32 2147483648, %v57_v23 }
  0x93   :  { %vm63_vm2 = vcmp.eq.f32.partialorder %v57_v23, 0.0 }
  0x94   :  { %v58_v26 = vadd.f32 1e-05, %v56_v25 }
  0x96   :  { %2170 = vrsqrt.f32 %v58_v26  ;;  %vm68_vm3 = vcmp.eq.f32.partialorder %v58_v26, inf  ;;  %v71_v34 = vand.u32 2147483648, %v58_v26  ;;  %vm70_vm4 = vcmp.eq.f32.partialorder %v58_v26, 0.0 }
  0x9f   :  { %v2169_v27 = vpop.eup %2168 }
  0xa0   :  { %v60_v28 = vmul.f32 %v2169_v27, %v57_v23 }
  0xa2   :  { %v62_v30 = vsel %vm61_vm1, %v57_v23, %v60_v28 }
  0xa3   :  { %v2171_v31 = vpop.eup %2170  ;;  %v65_v32 = vsel %vm63_vm2, %v64_v29, %v62_v30 }
  0xa4   :  { %v67_v33 = vmul.f32 %v2171_v31, %v58_v26  ;;  %v73_v36 = vmul.f32 %v65_v32, %v2325_v0  ;;  %v1712_v0 = vld [vmem:[%s2787_s1 + $0x28] sm:$0xff]  ;;  %s2261_s1 = smov 64  }
  0xa6   :  { %v69_v35 = vsel %vm68_vm3, %v58_v26, %v67_v33  ;;  %v81_v40 = vmul.f32 %v1713_v37, %v73_v36 }
  0xa7   :  { %v72_v38 = vsel %vm70_vm4, %v71_v34, %v69_v35 }
  0xa8   :  { %v74_v39 = vmul.f32 %v72_v38, %v2330_v1 }
  0xaa   :  { %v82_v41 = vmul.f32 %v1713_v37, %v74_v39 }
  0xac   :  { %v83_v42 = vpack.c.bf16 %v82_v41, %v81_v40 }
  0xae   :  { %1918 = vmatmul.mubr.bf16.vlgmr.msra.gmra.mxu0 %v83_v42  ;;  %1938 = vmatmul.mubr.bf16.vlgmr.msra.gmra.mxu1 %v83_v42 }
  0xaf   :  { %1943 = vmatprep.mubr.msk.bf16.mxu0 %vm2257_vm0, %v2256_v6  ;;  %1949 = vmatprep.mubr.msk.bf16.mxu1 %vm2257_vm0, %v2256_v6 }
 0x16e   :  { %v182_v43 = vpop.f32.mrf.mxu0  ;;  %v287_v44 = vpop.f32.mrf.mxu1 }
 0x16f   :  { %296 = vrot.lane.b32.xlu1 %v182_v43, %s2258_s29  ;;  %v294_v57 = vmul.f32 %v182_v43, %v39_v52  ;;  %v312_v13 = vmul.f32 %v287_v44, %v39_v52 }
 0x170   :  { %v1919_v45 = vpop.f32.mrf.mxu0  ;;  %v1939_v46 = vpop.f32.mrf.mxu1 }
 0x172   :  { %v185_v47 = vpop.f32.mrf.mxu0  ;;  %v290_v48 = vpop.f32.mrf.mxu1 }
 0x173   :  { %304 = vrot.lane.b32.xlu1 %v182_v43, %s2259_s2  ;;  %298 = vrot.lane.b32.xlu0 %v185_v47, %s2258_s29  ;;  %v295_v1 = vmul.f32 %v185_v47, %v40_v58  ;;  %v313_v14 = vmul.f32 %v290_v48, %v40_v58 }
 0x174   :  { %v1920_v49 = vpop.f32.mrf.mxu0  ;;  %v1940_v50 = vpop.f32.mrf.mxu1 }
 0x177   :  { %306 = vrot.lane.b32.xlu1 %v185_v47, %s2259_s2 }
 0x17b   :  { %314 = vrot.lane.b32.xlu1 %v287_v44, %s2258_s29 }
 0x17f   :  { %322 = vrot.lane.b32.xlu1 %v287_v44, %s2259_s2 }
 0x183   :  { %316 = vrot.lane.b32.xlu1 %v290_v48, %s2258_s29 }
 0x187   :  { %324 = vrot.lane.b32.xlu1 %v290_v48, %s2259_s2 }
 0x1e1   :  { %v297_v53 = vpop.permute.xlu1 %296 }
 0x1e2   :  { %v300_v54 = vmul.f32 %v1709_v51, %v297_v53 }
 0x1e4   :  { %v302_v61 = vadd.f32 %v300_v54, %v294_v57 }
 0x1e5   :  { %v305_v59 = vpop.permute.xlu1 %304  ;;  %v299_v60 = vpop.permute.xlu0 %298 }
 0x1e6   :  { %v308_v62 = vmul.f32 %v1711_v55, %v305_v59  ;;  %v301_v63 = vmul.f32 %v1710_v56, %v299_v60 }
 0x1e8   :  { %v310_v2 = vadd.f32 %v308_v62, %v302_v61  ;;  %v303_v4 = vadd.f32 %v301_v63, %v295_v1 }
 0x1e9   :  { %v307_v3 = vpop.permute.xlu1 %306 }
 0x1ea   :  { %v309_v5 = vmul.f32 %v1712_v0, %v307_v3  ;;  %332 = vrot.lane.b32.xlu1 %v310_v2, %s2260_s22 }
 0x1ec   :  { %v311_v7 = vadd.f32 %v309_v5, %v303_v4 }
 0x1ed   :  { %v315_v8 = vpop.permute.xlu1 %314 }
 0x1ee   :  { %607 = vrot.lane.b32.xlu0 %v311_v7, %s2260_s22  ;;  %v318_v11 = vmul.f32 %v1709_v51, %v315_v8 }
 0x1f0   :  { %v320_v17 = vadd.f32 %v318_v11, %v312_v13 }
 0x1f1   :  { %v323_v9 = vpop.permute.xlu1 %322 }
 0x1f2   :  { %v326_v15 = vmul.f32 %v1711_v55, %v323_v9 }
 0x1f4   :  { %v328_v20 = vadd.f32 %v326_v15, %v320_v17 }
 0x1f5   :  { %v317_v10 = vpop.permute.xlu1 %316 }
 0x1f6   :  { %v319_v12 = vmul.f32 %v1710_v56, %v317_v10 }
 0x1f8   :  { %v321_v18 = vadd.f32 %v319_v12, %v313_v14 }
 0x1f9   :  { %v325_v16 = vpop.permute.xlu1 %324 }
 0x1fa   :  { %v327_v19 = vmul.f32 %v1712_v0, %v325_v16 }
 0x1fc   :  { %v329_v21 = vadd.f32 %v327_v19, %v321_v18 }
 0x1fe   :  { %v2435_v22 = vpack.c.bf16 %v329_v21, %v328_v20 }
 0x200   :  { %471 = vrot.lane.b32.xlu1 %v2435_v22, %s2260_s22  ;;  %v341_v23 = vsel %vm336_vm5, %v2435_v22, 0  ;;  %v2442_v24 = vrot.slane %v2435_v22, 4 }
 0x201   :  { %1942 = vmatpush3.bf16.xpose.msra.mxu0 %v341_v23 }
 0x202   :  { %1953 = vmatprep.subr.bf16.mxu0 %v2256_v6  ;;  %v616_v32 = vsel %vm336_vm5, %v2442_v24, 0 }
 0x204   :  { %742 = vrot.lane.b32.xlu1 %v2442_v24, %s2260_s22 }
 0x25c   :  { %v333_v25 = vpop.permute.xlu1 %332 }
 0x25d   :  { %v335_v26 = vpack.c.bf16 %v333_v25, %v310_v2 }
 0x25f   :  { %1944 = vmatmul.mubr.msk.bf16.vlgmr.msra.gmra.mxu0 %vm336_vm5, %v335_v26  ;;  %469 = vrot.lane.b32.xlu0 %v335_v26, %s2261_s1 }
 0x260   :  { %v608_v27 = vpop.permute.xlu0 %607  ;;  %1955 = vmatprep.mubr.msk.bf16.mxu0 %vm2257_vm0, %v2256_v6 }
 0x261   :  { %v610_v28 = vpack.c.bf16 %v608_v27, %v311_v7 }
 0x263   :  { %740 = vrot.lane.b32.xlu0 %v610_v28, %s2261_s1 }
 0x272   :  { %v472_v29 = vpop.permute.xlu1 %471 }
 0x273   :  { %v477_v30 = vsel %vm336_vm5, %v472_v29, 0 }
 0x274   :  { %1954 = vmatpush3.bf16.xpose.msra.mxu0 %v477_v30 }
 0x275   :  { %1965 = vmatprep.subr.bf16.mxu0 %v2256_v6 }
 0x276   :  { %v743_v33 = vpop.permute.xlu1 %742 }
 0x277   :  { %v748_v34 = vsel %vm336_vm5, %v743_v33, 0 }
 0x2d1   :  { %v470_v31 = vpop.permute.xlu0 %469 }
 0x2d2   :  { %1956 = vmatmul.mubr.msk.bf16.vlgmr.msra.gmra.mxu0 %vm336_vm5, %v470_v31 }
 0x2d3   :  { %1966 = vmatpush3.bf16.xpose.msra.mxu0 %v616_v32  ;;  %1967 = vmatprep.mubr.msk.bf16.mxu0 %vm2257_vm0, %v2256_v6 }
 0x2d4   :  { %1977 = vmatprep.subr.bf16.mxu0 %v2256_v6 }
 0x2d5   :  { %v741_v35 = vpop.permute.xlu0 %740 }
 0x2da   :  { %1968 = vmatmul.mubr.msk.bf16.vlgmr.msra.gmra.mxu0 %vm336_vm5, %v610_v28 }
 0x2db   :  { %1978 = vmatpush3.bf16.xpose.msra.mxu0 %v748_v34  ;;  %1979 = vmatprep.mubr.msk.bf16.mxu0 %vm2257_vm0, %v2256_v6 }
 0x2dc   :  { %1989 = vmatprep.subr.bf16.mxu0 %v2256_v6 }
 0x2e2   :  { %1980 = vmatmul.mubr.msk.bf16.vlgmr.msra.gmra.mxu0 %vm336_vm5, %v741_v35 }
 0x2e3   :  { %2005 = vmatprep.mubr.msk.bf16.mxu0 %vm2257_vm0, %v2256_v6 }
 0x31f   :  { %v377_v36 = vpop.f32.mrf.mxu0 }
 0x320   :  { %v384_v37 = vmul.f32 0.17677669, %v377_v36 }
 0x321   :  { %v1945_v38 = vpop.f32.mrf.mxu0 }
 0x322   :  { %v387_v39 = vsel %vm386_vm6, %v384_v37, -inf }
 0x323   :  { %388 = vmax.xlane.f32.xlu1 %v387_v39  ;;  %v380_v40 = vpop.f32.mrf.mxu0 }
 0x324   :  { %v385_v41 = vmul.f32 0.17677669, %v380_v40 }
 0x325   :  { %v1946_v42 = vpop.f32.mrf.mxu0 }
 0x326   :  { %v390_v43 = vsel %vm386_vm6, %v385_v41, -inf }
 0x327   :  { %391 = vmax.xlane.f32.xlu0 %v390_v43 }
 0x392   :  { %v513_v44 = vpop.f32.mrf.mxu0 }
 0x393   :  { %v520_v45 = vmul.f32 0.17677669, %v513_v44 }
 0x394   :  { %v1957_v46 = vpop.f32.mrf.mxu0 }
 0x395   :  { %v522_v47 = vsel %vm386_vm6, %v520_v45, -inf }
 0x396   :  { %523 = vmax.xlane.f32.xlu0 %v522_v47  ;;  %v516_v48 = vpop.f32.mrf.mxu0 }
 0x397   :  { %v521_v49 = vmul.f32 0.17677669, %v516_v48 }
 0x398   :  { %v1958_v50 = vpop.f32.mrf.mxu0 }
 0x399   :  { %v525_v51 = vsel %vm386_vm6, %v521_v49, -inf }
 0x39a   :  { %526 = vmax.xlane.f32.xlu1 %v525_v51  ;;  %v652_v52 = vpop.f32.mrf.mxu0 }
 0x39b   :  { %v2472_v53 = vmul.f32 0.17677669, %v652_v52 }
 0x39c   :  { %v1969_v54 = vpop.f32.mrf.mxu0 }
 0x39d   :  { %v661_v55 = vsel %vm386_vm6, %v2472_v53, -inf }
 0x39e   :  { %662 = vmax.xlane.f32.xlu0 %v661_v55  ;;  %v655_v56 = vpop.f32.mrf.mxu0 }
 0x39f   :  { %v660_v57 = vmul.f32 0.17677669, %v655_v56 }
 0x3a0   :  { %v1970_v58 = vpop.f32.mrf.mxu0 }
 0x3a1   :  { %v664_v59 = vsel %vm386_vm6, %v660_v57, -inf }
 0x3a2   :  { %665 = vmax.xlane.f32.xlu1 %v664_v59  ;;  %v784_v60 = vpop.f32.mrf.mxu0 }
 0x3a3   :  { %v791_v61 = vmul.f32 0.17677669, %v784_v60 }
 0x3a4   :  { %v1981_v62 = vpop.f32.mrf.mxu0 }
 0x3a5   :  { %v793_v63 = vsel %vm386_vm6, %v791_v61, -inf }
 0x3a6   :  { %794 = vmax.xlane.f32.xlu0 %v793_v63  ;;  %v787_v0 = vpop.f32.mrf.mxu0 }
 0x3a7   :  { %v792_v1 = vmul.f32 0.17677669, %v787_v0 }
 0x3a8   :  { %v1982_v2 = vpop.f32.mrf.mxu0 }
 0x3a9   :  { %v796_v3 = vsel %vm386_vm6, %v792_v1, -inf }
 0x3aa   :  { %797 = vmax.xlane.f32.xlu1 %v796_v3 }
 0x3ac   :  { %v389_v4 = vpop.xlane.xlu1 %388 }
 0x3ad   :  { %v393_v5 = vsub.f32 %v384_v37, %v389_v4 }
 0x3af   :  { %v395_v7 = vmul.f32 1.442695, %v393_v5 }
 0x3b0   :  { %v392_v8 = vpop.xlane.xlu0 %391 }
 0x3b1   :  { %2172 = vpow2.f32 %v395_v7  ;;  %v394_v9 = vsub.f32 %v385_v41, %v392_v8 }
 0x3b3   :  { %v397_v10 = vmul.f32 1.442695, %v394_v9 }
 0x3b5   :  { %2174 = vpow2.f32 %v397_v10 }
 0x3be   :  { %v2479_v11 = vpop.eup %2172 }
 0x3bf   :  { %v399_v12 = vsel %vm386_vm6, %v2479_v11, 0.0 }
 0x3c0   :  { %400 = vadd.xlane.f32.xlu0 %v399_v12 }
 0x3c2   :  { %v2175_v13 = vpop.eup %2174 }
 0x3c3   :  { %v402_v14 = vsel %vm386_vm6, %v2175_v13, 0.0 }
 0x3c4   :  { %403 = vadd.xlane.f32.xlu1 %v402_v14 }
 0x3d5   :  { %545 = vrot.lane.b32.xlu1 %v2435_v22, %s2262_s23 }
 0x41f   :  { %v524_v15 = vpop.xlane.xlu0 %523 }
 0x420   :  { %v528_v16 = vsub.f32 %v520_v45, %v524_v15 }
 0x422   :  { %v530_v17 = vmul.f32 1.442695, %v528_v16 }
 0x423   :  { %v527_v18 = vpop.xlane.xlu1 %526 }
 0x424   :  { %2176 = vpow2.f32 %v530_v17  ;;  %v529_v19 = vsub.f32 %v521_v49, %v527_v18 }
 0x426   :  { %v532_v20 = vmul.f32 1.442695, %v529_v19 }
 0x427   :  { %v663_v37 = vpop.xlane.xlu0 %662 }
 0x428   :  { %2178 = vpow2.f32 %v532_v20  ;;  %v667_v38 = vsub.f32 %v2472_v53, %v663_v37  ;;  %v2103_v37 = vld [vmem:[%s2791_s5] sm:$0xff]  }
 0x42a   :  { %v669_v40 = vmul.f32 1.442695, %v667_v38 }
 0x42b   :  { %v666_v21 = vpop.xlane.xlu1 %665 }
 0x42c   :  { %v668_v23 = vsub.f32 %v660_v57, %v666_v21 }
 0x42e   :  { %v671_v25 = vmul.f32 1.442695, %v668_v23  ;;  %v2096_v23 = vld [vmem:[%s2791_s5 + $0x38] sm:$0xff]  }
 0x42f   :  { %v795_v39 = vpop.xlane.xlu0 %794  ;;  %1990 = vmatpush3.bf16.msra.mxu0 %v2096_v23  ;;  %v2135_v23 = vld [vmem:[%s2793_s7 + $0x8] ss:$12 sps:$4 sm:$0xff]  }
 0x430   :  { %2180 = vpow2.f32 %v671_v25  ;;  %v799_v41 = vsub.f32 %v791_v61, %v795_v39  ;;  %v2097_v25 = vld [vmem:[%s2791_s5 + $0x30] sm:$0xff]   ;;  %1991 = vmatprep.subr.bf16.mxu0 %v2256_v6 }
 0x431   :  { %v2177_v26 = vpop.eup %2176 }
 0x432   :  { %v534_v27 = vsel %vm386_vm6, %v2177_v26, 0.0  ;;  %v801_v42 = vmul.f32 1.442695, %v799_v41 }
 0x433   :  { %535 = vadd.xlane.f32.xlu0 %v534_v27  ;;  %v798_v28 = vpop.xlane.xlu1 %797  ;;  %1992 = vmatpush3.bf16.msra.mxu0 %v2097_v25 }
 0x434   :  { %v800_v29 = vsub.f32 %v792_v1, %v798_v28  ;;  %1993 = vmatprep.subr.bf16.mxu0 %v2256_v6 }
 0x435   :  { %v2179_v30 = vpop.eup %2178 }
 0x436   :  { %v803_v31 = vmul.f32 1.442695, %v800_v29  ;;  %v537_v32 = vsel %vm386_vm6, %v2179_v30, 0.0  ;;  %v2099_v29 = vld [vmem:[%s2791_s5 + $0x20] sm:$0xff]  }
 0x437   :  { %538 = vadd.xlane.f32.xlu1 %v537_v32  ;;  %v2100_v32 = vld [vmem:[%s2791_s5 + $0x18] sm:$0xff]  }
 0x438   :  { %2182 = vpow2.f32 %v803_v31 }
 0x439   :  { %2184 = vpow2.f32 %v669_v40 }
 0x43a   :  { %2186 = vpow2.f32 %v801_v42 }
 0x43d   :  { %v2488_v33 = vpop.eup %2180 }
 0x43e   :  { %v676_v34 = vsel %vm386_vm6, %v2488_v33, 0.0 }
 0x43f   :  { %677 = vadd.xlane.f32.xlu1 %v676_v34 }
 0x445   :  { %v2492_v35 = vpop.eup %2182 }
 0x446   :  { %v808_v36 = vsel %vm386_vm6, %v2492_v35, 0.0  ;;  %v2185_v43 = vpop.eup %2184 }
 0x447   :  { %809 = vadd.xlane.f32.xlu1 %v808_v36  ;;  %v673_v44 = vsel %vm386_vm6, %v2185_v43, 0.0  ;;  %v2187_v45 = vpop.eup %2186 }
 0x448   :  { %v805_v46 = vsel %vm386_vm6, %v2187_v45, 0.0 }
 0x449   :  { %411 = vrot.lane.b32.xlu0 %v2435_v22, %s2261_s1  ;;  %v401_v47 = vpop.xlane.xlu0 %400 }
 0x44d   :  { %v404_v22 = vpop.xlane.xlu1 %403 }
 0x44e   :  { %2188 = vrcp.f32 %v404_v22 }
 0x44f   :  { %2190 = vrcp.f32 %v401_v47 }
 0x451   :  { %v546_v49 = vpop.permute.xlu1 %545 }
 0x452   :  { %v551_v57 = vsel %vm416_vm7, %v546_v49, 0 }
 0x458   :  { %684 = vrot.lane.b32.xlu1 %v2442_v24, %s2261_s1 }
 0x45b   :  { %v2189_v48 = vpop.eup %2188 }
 0x45c   :  { %v2191_v51 = vpop.eup %2190  ;;  %v408_v52 = vmul.f32 %v2189_v48, %v2175_v13 }
 0x45d   :  { %v407_v56 = vmul.f32 %v2191_v51, %v2479_v11 }
 0x468   :  { %674 = vadd.xlane.f32.xlu0 %v673_v44 }
 0x46c   :  { %806 = vadd.xlane.f32.xlu0 %v805_v46 }
 0x482   :  { %816 = vrot.lane.b32.xlu0 %v2442_v24, %s2262_s23  ;;  %v409_v24 = vpack.c.bf16 %v408_v52, %v407_v56  ;;  %v2104_v52 = vld [vmem:[%s2793_s7 + $0xa8] ss:$12 sps:$4 sm:$0xff]  }
 0x4bc   :  { %v536_v50 = vpop.xlane.xlu0 %535 }
 0x4bd   :  { %2192 = vrcp.f32 %v536_v50 }
 0x4c0   :  { %v412_v53 = vpop.permute.xlu0 %411  ;;  %v539_v54 = vpop.xlane.xlu1 %538 }
 0x4c1   :  { %v418_v55 = vsel %vm416_vm7, %v412_v53, 0  ;;  %2194 = vrcp.f32 %v539_v54  ;;  %v2106_v53 = vld [vmem:[%s2793_s7 + $0xac] ss:$12 sps:$4 sm:$0xff]  }
 0x4c2   :  { %1948 = vmatpush3.bf16.msra.mxu1 %v418_v55  ;;  %v2232_v55 = vld [vmem:[%s2786_s0] sm:$0xff] }
 0x4c3   :  { %1959 = vmatprep.subr.bf16.mxu1 %v2256_v6 }
 0x4c5   :  { %1950 = vmatmul.mubr.msk.bf16.vlgmr.msra.gmra.mxu1 %vm386_vm6, %v409_v24 }
 0x4c6   :  { %1960 = vmatpush3.bf16.msra.mxu1 %v551_v57  ;;  %1961 = vmatprep.mubr.msk.bf16.mxu1 %vm2257_vm0, %v2256_v6 }
 0x4c7   :  { %1971 = vmatprep.subr.bf16.mxu1 %v2256_v6 }
 0x4c8   :  { %v678_v59 = vpop.xlane.xlu1 %677 }
 0x4c9   :  { %2196 = vrcp.f32 %v678_v59  ;;  %v2233_v59 = vld [vmem:[%s2786_s0 + $0x8] sm:$0xff] }
 0x4ca   :  { %v2193_v58 = vpop.eup %2192 }
 0x4cb   :  { %v542_v61 = vmul.f32 %v2193_v58, %v2177_v26  ;;  %v2098_v26 = vld [vmem:[%s2791_s5 + $0x28] sm:$0xff]  }
 0x4cc   :  { %1994 = vmatpush3.bf16.msra.mxu0 %v2098_v26 }
 0x4cd   :  { %1995 = vmatprep.subr.bf16.mxu0 %v2256_v6 }
 0x4ce   :  { %v2195_v60 = vpop.eup %2194 }
 0x4cf   :  { %v543_v62 = vmul.f32 %v2195_v60, %v2179_v30 }
 0x4d0   :  { %v810_v63 = vpop.xlane.xlu1 %809  ;;  %1996 = vmatpush3.bf16.msra.mxu0 %v2099_v29 }
 0x4d1   :  { %v544_v0 = vpack.c.bf16 %v543_v62, %v542_v61  ;;  %1997 = vmatprep.subr.bf16.mxu0 %v2256_v6 }
 0x4d3   :  { %1962 = vmatmul.mubr.msk.bf16.vlgmr.msra.gmra.mxu1 %vm386_vm6, %v544_v0  ;;  %v2110_v0 = vld [vmem:[%s2793_s7 + $0x94] ss:$12 sps:$4 sm:$0xff]  }
 0x4d4   :  { %v685_v1 = vpop.permute.xlu1 %684  ;;  %1973 = vmatprep.mubr.msk.bf16.mxu1 %vm2257_vm0, %v2256_v6  ;;  %1998 = vmatpush3.bf16.msra.mxu0 %v2100_v32 }
 0x4d5   :  { %v690_v2 = vsel %vm416_vm7, %v685_v1, 0  ;;  %1999 = vmatprep.subr.bf16.mxu0 %v2256_v6  ;;  %v2108_v1 = vld [vmem:[%s2793_s7 + $0x90] ss:$12 sps:$4 sm:$0xff]  }
 0x4d6   :  { %1972 = vmatpush3.bf16.msra.mxu1 %v690_v2  ;;  %v2197_v5 = vpop.eup %2196  ;;  %v2111_v2 = vld [vmem:[%s2793_s7 + $0x98] ss:$12 sps:$4 sm:$0xff]  }
 0x4d7   :  { %1983 = vmatprep.subr.bf16.mxu1 %v2256_v6  ;;  %v682_v9 = vmul.f32 %v2197_v5, %v2488_v33  ;;  %v2101_v33 = vld [vmem:[%s2791_s5 + $0x10] sm:$0xff]   ;;  %v2115_v5 = vld [vmem:[%s2793_s7 + $0x80] ss:$12 sps:$4 sm:$0xff]  }
 0x4d8   :  { %2000 = vmatpush3.bf16.msra.mxu0 %v2101_v33 }
 0x4d9   :  { %2001 = vmatprep.subr.bf16.mxu0 %v2256_v6 }
 0x4f1   :  { %v675_v3 = vpop.xlane.xlu0 %674 }
 0x4f2   :  { %2198 = vrcp.f32 %v675_v3  ;;  %v2114_v3 = vld [vmem:[%s2793_s7 + $0x7c] ss:$12 sps:$4 sm:$0xff]  }
 0x4f5   :  { %v807_v4 = vpop.xlane.xlu0 %806 }
 0x4f6   :  { %2200 = vrcp.f32 %v807_v4  ;;  %v2112_v4 = vld [vmem:[%s2793_s7 + $0x78] ss:$12 sps:$4 sm:$0xff]  }
 0x4f7   :  { %2202 = vrcp.f32 %v810_v63  ;;  %v2107_v63 = vld [vmem:[%s2793_s7 + $0xb0] ss:$12 sps:$4 sm:$0xff]  }
 0x4f9   :  { %v817_v10 = vpop.permute.xlu0 %816 }
 0x4fa   :  { %v822_v13 = vsel %vm416_vm7, %v817_v10, 0  ;;  %v2122_v10 = vld [vmem:[%s2793_s7 + $0x4c] ss:$12 sps:$4 sm:$0xff]  }
 0x4ff   :  { %v2199_v7 = vpop.eup %2198 }
 0x500   :  { %v681_v8 = vmul.f32 %v2199_v7, %v2185_v43  ;;  %v2118_v7 = vld [vmem:[%s2793_s7 + $0x64] ss:$12 sps:$4 sm:$0xff]  }
 0x502   :  { %v683_v11 = vpack.c.bf16 %v682_v9, %v681_v8  ;;  %v2116_v8 = vld [vmem:[%s2793_s7 + $0x60] ss:$12 sps:$4 sm:$0xff]   ;;  %v2119_v9 = vld [vmem:[%s2793_s7 + $0x68] ss:$12 sps:$4 sm:$0xff]  }
 0x503   :  { %v2201_v12 = vpop.eup %2200 }
 0x504   :  { %1974 = vmatmul.mubr.msk.bf16.vlgmr.msra.gmra.mxu1 %vm386_vm6, %v683_v11  ;;  %v2203_v14 = vpop.eup %2202  ;;  %v813_v15 = vmul.f32 %v2201_v12, %v2187_v45  ;;  %v2120_v11 = vld [vmem:[%s2793_s7 + $0x48] ss:$12 sps:$4 sm:$0xff]   ;;  %v2123_v12 = vld [vmem:[%s2793_s7 + $0x50] ss:$12 sps:$4 sm:$0xff]  }
 0x505   :  { %1984 = vmatpush3.bf16.msra.mxu1 %v822_v13  ;;  %1985 = vmatprep.mubr.msk.bf16.mxu1 %vm2257_vm0, %v2256_v6  ;;  %v814_v16 = vmul.f32 %v2203_v14, %v2492_v35  ;;  %v2102_v35 = vld [vmem:[%s2791_s5 + $0x8] sm:$0xff]   ;;  %v2126_v13 = vld [vmem:[%s2793_s7 + $0x34] ss:$12 sps:$4 sm:$0xff]   ;;  %v2124_v14 = vld [vmem:[%s2793_s7 + $0x30] ss:$12 sps:$4 sm:$0xff]  }
 0x506   :  { %2002 = vmatpush3.bf16.msra.mxu0 %v2102_v35  ;;  %1181 = vmatprep.subr.bf16.mxu1 %v2106_v53  ;;  %v2143_v53 = vld [vmem:[%s2795_s9] sm:$0xff]  }
 0x507   :  { %v815_v17 = vpack.c.bf16 %v814_v16, %v813_v15  ;;  %2003 = vmatprep.subr.bf16.mxu0 %v2256_v6  ;;  %v2127_v15 = vld [vmem:[%s2793_s7 + $0x38] ss:$12 sps:$4 sm:$0xff]  }
 0x508   :  { %v2128_v16 = vld [vmem:[%s2793_s7 + $0x18] ss:$12 sps:$4 sm:$0xff]  }
 0x50a   :  { %2004 = vmatpush3.bf16.msra.mxu0 %v2103_v37 }
 0x50b   :  { %2009 = vmatprep.subr.bf16.mxu0 %v2256_v6 }
 0x50c   :  { %1986 = vmatmul.mubr.msk.bf16.vlgmr.msra.gmra.mxu1 %vm386_vm6, %v815_v17  ;;  %v2130_v17 = vld [vmem:[%s2793_s7 + $0x1c] ss:$12 sps:$4 sm:$0xff]  }
 0x50d   :  { %1182 = vmatpush1.bf16.msra.mxu1 %v2104_v52  ;;  %v2142_v52 = vld [vmem:[%s2795_s9 + $0x8] sm:$0xff]  }
 0x50e   :  { %1183 = vmatprep.subr.bf16.mxu1 %v2110_v0  ;;  %v2153_v0 = vld [vmem:[%s2794_s8 + $0xa0] sm:$0xff]  }
 0x511   :  { %1184 = vmatpush1.bf16.msra.mxu1 %v2108_v1  ;;  %v2154_v1 = vld [vmem:[%s2794_s8 + $0x60] sm:$0xff]  }
 0x512   :  { %1185 = vmatprep.subr.bf16.mxu1 %v2114_v3  ;;  %v2156_v3 = vld [vmem:[%s2794_s8 + $0x98] sm:$0xff]  }
 0x515   :  { %1186 = vmatpush1.bf16.msra.mxu1 %v2112_v4  ;;  %v2157_v4 = vld [vmem:[%s2794_s8 + $0x58] sm:$0xff]  }
 0x516   :  { %1187 = vmatprep.subr.bf16.mxu1 %v2118_v7  ;;  %v2159_v7 = vld [vmem:[%s2794_s8 + $0x90] sm:$0xff]  }
 0x519   :  { %1188 = vmatpush1.bf16.msra.mxu1 %v2116_v8  ;;  %v2160_v8 = vld [vmem:[%s2794_s8 + $0x50] sm:$0xff]  }
 0x51a   :  { %1189 = vmatprep.subr.bf16.mxu1 %v2122_v10  ;;  %v2162_v10 = vld [vmem:[%s2794_s8 + $0x88] sm:$0xff]  }
 0x51d   :  { %1190 = vmatpush1.bf16.msra.mxu1 %v2120_v11  ;;  %v2163_v11 = vld [vmem:[%s2794_s8 + $0x48] sm:$0xff]  }
 0x51e   :  { %1191 = vmatprep.subr.bf16.mxu1 %v2126_v13  ;;  %v2165_v13 = vld [vmem:[%s2794_s8 + $0x80] sm:$0xff]  }
 0x521   :  { %1192 = vmatpush1.bf16.msra.mxu1 %v2124_v14  ;;  %v2166_v14 = vld [vmem:[%s2794_s8 + $0x40] sm:$0xff]  }
 0x522   :  { %1193 = vmatprep.subr.bf16.mxu1 %v2130_v17 }
 0x525   :  { %1194 = vmatpush1.bf16.msra.mxu1 %v2128_v16 }
 0x585   :  { %v454_v18 = vpop.f32.mrf.mxu1 }
 0x586   :  { %461 = vst.msk [vmem:[#allocation2] sm:$0xff] %vm336_vm5, %v454_v18  ;;  %v2131_v18 = vld [vmem:[%s2793_s7 + $0x20] ss:$12 sps:$4 sm:$0xff]  }
 0x587   :  { %v1951_v19 = vpop.f32.mrf.mxu1 }
 0x588   :  { %v2134_v19 = vld [vmem:[%s2793_s7 + $0x4] ss:$12 sps:$4 sm:$0xff]  }
 0x589   :  { %v457_v20 = vpop.f32.mrf.mxu1  ;;  %1195 = vmatprep.subr.bf16.mxu1 %v2134_v19 }
 0x58a   :  { %463 = vrot.lane.b32.xlu1 %v457_v20, %s2262_s23  ;;  %v2132_v20 = vld [vmem:[%s2793_s7] ss:$12 sps:$4 sm:$0xff]  }
 0x58b   :  { %v1952_v21 = vpop.f32.mrf.mxu1  ;;  %1196 = vmatpush1.bf16.msra.mxu1 %v2132_v20 }
 0x58c   :  { %v2263_v21 = vmov 0   ;;  %2029 = vmatprep.subr.bf16.mxu1 %v2256_v6 }
 0x58d   :  { %1213 = vmatprep.mubr.bf16.mxu1 %v2263_v21 }
 0x593   :  { %v587_v27 = vpop.f32.mrf.mxu1 }
 0x594   :  { %595 = vrot.lane.b32.xlu1 %v587_v27, %s2261_s1 }
 0x595   :  { %v1963_v28 = vpop.f32.mrf.mxu1 }
 0x597   :  { %v590_v30 = vpop.f32.mrf.mxu1 }
 0x598   :  { %601 = vrot.lane.b32.xlu1 %v590_v30, %s2260_s22 }
 0x599   :  { %v1964_v31 = vpop.f32.mrf.mxu1 }
 0x5c4   :  { %v726_v34 = vpop.f32.mrf.mxu1 }
 0x5c5   :  { %733 = vst.msk [vmem:[#allocation2 + $0x8] sm:$0xff] %vm336_vm5, %v726_v34 }
 0x5c6   :  { %v1975_v36 = vpop.f32.mrf.mxu1 }
 0x5c8   :  { %v729_v38 = vpop.f32.mrf.mxu1 }
 0x5c9   :  { %735 = vrot.lane.b32.xlu0 %v729_v38, %s2262_s23 }
 0x5ca   :  { %v1976_v39 = vpop.f32.mrf.mxu1 }
 0x5cc   :  { %v858_v40 = vpop.f32.mrf.mxu1 }
 0x5cd   :  { %866 = vrot.lane.b32.xlu0 %v858_v40, %s2261_s1 }
 0x5ce   :  { %v1987_v41 = vpop.f32.mrf.mxu1 }
 0x5cf   :  { %v1746_v41 = vld [vmem:[%s2792_s6] ss:$0 sm:$0xff] }
 0x5d0   :  { %v861_v42 = vpop.f32.mrf.mxu1 }
 0x5d1   :  { %871 = vrot.lane.b32.xlu0 %v861_v42, %s2260_s22 }
 0x5d2   :  { %v1988_v43 = vpop.f32.mrf.mxu1 }
 0x5fc   :  { %v464_v44 = vpop.permute.xlu1 %463 }
 0x5fd   :  { %467 = vst.msk [vmem:[#allocation2] sm:$0xff] %vm466_vm8, %v464_v44 }
 0x606   :  { %v596_v45 = vpop.permute.xlu1 %595 }
 0x607   :  { %599 = vst.msk [vmem:[#allocation2] sm:$0xff] %vm598_vm9, %v596_v45 }
 0x60a   :  { %v602_v46 = vpop.permute.xlu1 %601 }
 0x60b   :  { %605 = vst.msk [vmem:[#allocation2] sm:$0xff] %vm604_vm10, %v602_v46  ;;  %v2136_v46 = vld [vmem:[%s2795_s9 + $0x38] sm:$0xff]  }
 0x612   :  { %v875_v49 = vld [vmem:[#allocation2] sm:$0xff] }
 0x63b   :  { %v736_v22 = vpop.permute.xlu0 %735 }
 0x63c   :  { %738 = vst.msk [vmem:[#allocation2 + $0x8] sm:$0xff] %vm466_vm8, %v736_v22 }
 0x63f   :  { %v867_v47 = vpop.permute.xlu0 %866 }
 0x640   :  { %869 = vst.msk [vmem:[#allocation2 + $0x8] sm:$0xff] %vm598_vm9, %v867_v47  ;;  %v2137_v47 = vld [vmem:[%s2795_s9 + $0x30] sm:$0xff]  }
 0x643   :  { %v872_v48 = vpop.permute.xlu0 %871 }
 0x644   :  { %874 = vst.msk [vmem:[#allocation2 + $0x8] sm:$0xff] %vm604_vm10, %v872_v48  ;;  %v2138_v48 = vld [vmem:[%s2795_s9 + $0x28] sm:$0xff]  }
 0x64b   :  { %v876_v50 = vld [vmem:[#allocation2 + $0x8] sm:$0xff] }
 0x64c   :  { %v877_v51 = vpack.c.bf16 %v876_v50, %v875_v49  ;;  %v2139_v49 = vld [vmem:[%s2795_s9 + $0x20] sm:$0xff]   ;;  %v2140_v50 = vld [vmem:[%s2795_s9 + $0x18] sm:$0xff]  }
 0x64e   :  { %2006 = vmatmul.mubr.bf16.vlgmr.msra.gmra.mxu0 %v877_v51  ;;  %v2141_v51 = vld [vmem:[%s2795_s9 + $0x10] sm:$0xff]  }
 0x64f   :  { %2025 = vmatprep.mubr.msk.bf16.mxu0 %vm2257_vm0, %v2256_v6  ;;  %2010 = vmatpush3.bf16.msra.mxu0 %v2107_v63  ;;  %v2152_v63 = vld [vmem:[%s2794_s8 + $0x28] sm:$0xff]  }
 0x650   :  { %2011 = vmatprep.subr.bf16.mxu0 %v2256_v6 }
 0x653   :  { %2012 = vmatpush3.bf16.msra.mxu0 %v2111_v2  ;;  %v2155_v2 = vld [vmem:[%s2794_s8 + $0x20] sm:$0xff]  }
 0x654   :  { %2013 = vmatprep.subr.bf16.mxu0 %v2256_v6 }
 0x657   :  { %2014 = vmatpush3.bf16.msra.mxu0 %v2115_v5  ;;  %v2158_v5 = vld [vmem:[%s2794_s8 + $0x18] sm:$0xff]  }
 0x658   :  { %2015 = vmatprep.subr.bf16.mxu0 %v2256_v6 }
 0x65b   :  { %2016 = vmatpush3.bf16.msra.mxu0 %v2119_v9  ;;  %v2161_v9 = vld [vmem:[%s2794_s8 + $0x10] sm:$0xff]  }
 0x65c   :  { %2017 = vmatprep.subr.bf16.mxu0 %v2256_v6 }
 0x65f   :  { %2018 = vmatpush3.bf16.msra.mxu0 %v2123_v12  ;;  %v2164_v12 = vld [vmem:[%s2794_s8 + $0x8] sm:$0xff]  }
 0x660   :  { %2019 = vmatprep.subr.bf16.mxu0 %v2256_v6 }
 0x663   :  { %2020 = vmatpush3.bf16.msra.mxu0 %v2127_v15  ;;  %v2167_v15 = vld [vmem:[%s2794_s8] sm:$0xff]  }
 0x664   :  { %2021 = vmatprep.subr.bf16.mxu0 %v2256_v6 }
 0x667   :  { %2022 = vmatpush3.bf16.msra.mxu0 %v2131_v18 }
 0x668   :  { %2023 = vmatprep.subr.bf16.mxu0 %v2256_v6 }
 0x66b   :  { %2024 = vmatpush3.bf16.msra.mxu0 %v2135_v23 }
 0x70e   :  { %v976_v54 = vpop.f32.mrf.mxu0 }
 0x70f   :  { %v2576_v56 = vadd.f32 %v2232_v55, %v976_v54  ;;  %v2144_v54 = vld [vmem:[%s2794_s8 + $0xb8] sm:$0xff]  }
 0x710   :  { %v2007_v24 = vpop.f32.mrf.mxu0  ;;  %v2145_v55 = vld [vmem:[%s2794_s8 + $0x78] sm:$0xff]  }
 0x711   :  { %v986_v57 = vmul.f32 %v2576_v56, %v2576_v56  ;;  %v2146_v24 = vld [vmem:[%s2794_s8 + $0x38] sm:$0xff]   ;;  %1870 = vmatprep.subr.bf16.mxu0 %v2145_v55 }
 0x712   :  { %v979_v58 = vpop.f32.mrf.mxu0 }
 0x713   :  { %v2583_v60 = vadd.f32 %v2233_v59, %v979_v58  ;;  %988 = vadd.xlane.f32.xlu1 %v986_v57  ;;  %v2147_v57 = vld [vmem:[%s2794_s8 + $0xb0] sm:$0xff]  }
 0x714   :  { %v2008_v61 = vpop.f32.mrf.mxu0  ;;  %v2148_v58 = vld [vmem:[%s2794_s8 + $0x70] sm:$0xff]  }
 0x715   :  { %v987_v62 = vmul.f32 %v2583_v60, %v2583_v60  ;;  %v2149_v59 = vld [vmem:[%s2794_s8 + $0x30] sm:$0xff]   ;;  %v2150_v61 = vld [vmem:[%s2794_s8 + $0xa8] sm:$0xff]  }
 0x717   :  { %990 = vadd.xlane.f32.xlu0 %v987_v62  ;;  %v2151_v62 = vld [vmem:[%s2794_s8 + $0x68] sm:$0xff]   ;;  %s2264_s8 = smov [#allocation3]  }
 0x718   :  { %s1698_s22 = sshll.u32 %s2264_s8, 4  ;;  %s1699_s22 = int_to_ptr.vmem [resolvable:$true] %s1698_s22 }
 0x719   :  { %s2234_s1 = scalar_lea.vmem %s1699_s22, 256  ;;  %p2239_p1 = scmp.lt.s32.totalorder %s1699_s22, %s1699_s22 }
 0x71a   :  { %p2235_p0 = scmp.ne.s32.totalorder %s1699_s22, %s2234_s1  ;;  %p2240_p2 = scmp.lt.s32.totalorder %s2234_s1, %s2234_s1 }
 0x71c   :  { %p2241_p3 = por %p2240_p2, %p2239_p1 }
 0x71e   :  { %p2242_p4 = pnand %p2241_p3, %p2235_p0 }
 0x79c   :  { %v989_v25 = vpop.xlane.xlu1 %988 }
 0x79d   :  { %v992_v26 = vmul.f32 0.0078125, %v989_v25 }
 0x79f   :  { %v994_v27 = vadd.f32 1e-05, %v992_v26 }
 0x7a0   :  { %v991_v28 = vpop.xlane.xlu0 %990 }
 0x7a1   :  { %2204 = vrsqrt.f32 %v994_v27  ;;  %v993_v29 = vmul.f32 0.0078125, %v991_v28  ;;  %vm998_vm11 = vcmp.eq.f32.partialorder %v994_v27, inf  ;;  %v1001_v33 = vand.u32 2147483648, %v994_v27 }
 0x7a2   :  { %vm1000_vm12 = vcmp.eq.f32.partialorder %v994_v27, 0.0 }
 0x7a3   :  { %v995_v30 = vadd.f32 1e-05, %v993_v29 }
 0x7a5   :  { %2206 = vrsqrt.f32 %v995_v30  ;;  %vm1005_vm13 = vcmp.eq.f32.partialorder %v995_v30, inf  ;;  %v1008_v38 = vand.u32 2147483648, %v995_v30  ;;  %vm1007_vm14 = vcmp.eq.f32.partialorder %v995_v30, 0.0 }
 0x7ae   :  { %v2205_v31 = vpop.eup %2204 }
 0x7af   :  { %v997_v32 = vmul.f32 %v2205_v31, %v994_v27 }
 0x7b1   :  { %v999_v34 = vsel %vm998_vm11, %v994_v27, %v997_v32 }
 0x7b2   :  { %v2207_v35 = vpop.eup %2206  ;;  %v1002_v36 = vsel %vm1000_vm12, %v1001_v33, %v999_v34 }
 0x7b3   :  { %v1004_v37 = vmul.f32 %v2207_v35, %v995_v30  ;;  %v1010_v40 = vmul.f32 %v1002_v36, %v2576_v56 }
 0x7b5   :  { %v1006_v39 = vsel %vm1005_vm13, %v995_v30, %v1004_v37  ;;  %v1018_v44 = vmul.f32 %v1746_v41, %v1010_v40 }
 0x7b6   :  { %v1009_v42 = vsel %vm1007_vm14, %v1008_v38, %v1006_v39 }
 0x7b7   :  { %v1011_v43 = vmul.f32 %v1009_v42, %v2583_v60 }
 0x7b9   :  { %v1019_v45 = vmul.f32 %v1746_v41, %v1011_v43 }
 0x7bb   :  { %v1020_v22 = vpack.c.bf16 %v1019_v45, %v1018_v44 }
 0x7bd   :  { %1214 = vmatmul.mubr.bf16.vlgmr.msra.gmra.mxu1 %v1020_v22  ;;  %2026 = vmatmul.mubr.bf16.vlgmr.msra.gmra.mxu0 %v1020_v22 }
 0x7be   :  { %2030 = vmatpush3.bf16.msra.mxu1 %v2136_v46  ;;  %2045 = vmatprep.mubr.msk.bf16.mxu1 %vm2257_vm0, %v2256_v6 }
 0x7bf   :  { %2031 = vmatprep.subr.bf16.mxu1 %v2256_v6  ;;  %1871 = vmatpush3.bf16.msra.mxu0 %v2146_v24 }
 0x7c0   :  { %1872 = vmatprep.subr.bf16.mxu0 %v2148_v58 }
 0x7c2   :  { %2032 = vmatpush3.bf16.msra.mxu1 %v2137_v47 }
 0x7c3   :  { %2033 = vmatprep.subr.bf16.mxu1 %v2256_v6  ;;  %1873 = vmatpush3.bf16.msra.mxu0 %v2149_v59 }
 0x7c4   :  { %1874 = vmatprep.subr.bf16.mxu0 %v2151_v62 }
 0x7c6   :  { %2034 = vmatpush3.bf16.msra.mxu1 %v2138_v48 }
 0x7c7   :  { %2035 = vmatprep.subr.bf16.mxu1 %v2256_v6  ;;  %1875 = vmatpush3.bf16.msra.mxu0 %v2152_v63 }
 0x7c8   :  { %1876 = vmatprep.subr.bf16.mxu0 %v2154_v1 }
 0x7ca   :  { %2036 = vmatpush3.bf16.msra.mxu1 %v2139_v49 }
 0x7cb   :  { %2037 = vmatprep.subr.bf16.mxu1 %v2256_v6  ;;  %1877 = vmatpush3.bf16.msra.mxu0 %v2155_v2 }
 0x7cc   :  { %1878 = vmatprep.subr.bf16.mxu0 %v2157_v4 }
 0x7ce   :  { %2038 = vmatpush3.bf16.msra.mxu1 %v2140_v50 }
 0x7cf   :  { %2039 = vmatprep.subr.bf16.mxu1 %v2256_v6  ;;  %1879 = vmatpush3.bf16.msra.mxu0 %v2158_v5 }
 0x7d0   :  { %1880 = vmatprep.subr.bf16.mxu0 %v2160_v8 }
 0x7d2   :  { %2040 = vmatpush3.bf16.msra.mxu1 %v2141_v51 }
 0x7d3   :  { %2041 = vmatprep.subr.bf16.mxu1 %v2256_v6  ;;  %1881 = vmatpush3.bf16.msra.mxu0 %v2161_v9 }
 0x7d4   :  { %1882 = vmatprep.subr.bf16.mxu0 %v2163_v11 }
 0x7d6   :  { %2042 = vmatpush3.bf16.msra.mxu1 %v2142_v52 }
 0x7d7   :  { %2043 = vmatprep.subr.bf16.mxu1 %v2256_v6  ;;  %1883 = vmatpush3.bf16.msra.mxu0 %v2164_v12 }
 0x7d8   :  { %1884 = vmatprep.subr.bf16.mxu0 %v2166_v14 }
 0x7da   :  { %2044 = vmatpush3.bf16.msra.mxu1 %v2143_v53 }
 0x7db   :  { %2049 = vmatprep.subr.bf16.mxu1 %v2256_v6  ;;  %1885 = vmatpush3.bf16.msra.mxu0 %v2167_v15 }
 0x7dd   :  { %2046 = vmatmul.mubr.bf16.vlgmr.msra.gmra.mxu1 %v1020_v22 }
 0x7de   :  { %2065 = vmatprep.mubr.msk.bf16.mxu1 %vm2257_vm0, %v2256_v6  ;;  %2050 = vmatpush3.bf16.msra.mxu1 %v2144_v54 }
 0x7df   :  { %2051 = vmatprep.subr.bf16.mxu1 %v2256_v6 }
 0x7e2   :  { %2052 = vmatpush3.bf16.msra.mxu1 %v2147_v57 }
 0x7e3   :  { %2053 = vmatprep.subr.bf16.mxu1 %v2256_v6 }
 0x7e6   :  { %2054 = vmatpush3.bf16.msra.mxu1 %v2150_v61 }
 0x7e7   :  { %2055 = vmatprep.subr.bf16.mxu1 %v2256_v6 }
 0x7ea   :  { %2056 = vmatpush3.bf16.msra.mxu1 %v2153_v0 }
 0x7eb   :  { %2057 = vmatprep.subr.bf16.mxu1 %v2256_v6 }
 0x7ee   :  { %2058 = vmatpush3.bf16.msra.mxu1 %v2156_v3 }
 0x7ef   :  { %2059 = vmatprep.subr.bf16.mxu1 %v2256_v6 }
 0x7f2   :  { %2060 = vmatpush3.bf16.msra.mxu1 %v2159_v7 }
 0x7f3   :  { %2061 = vmatprep.subr.bf16.mxu1 %v2256_v6 }
 0x7f6   :  { %2062 = vmatpush3.bf16.msra.mxu1 %v2162_v10 }
 0x7f7   :  { %2063 = vmatprep.subr.bf16.mxu1 %v2256_v6 }
 0x7fa   :  { %2064 = vmatpush3.bf16.msra.mxu1 %v2165_v13 }
 0x87d   :  { %v1215_v16 = vpop.f32.mrf.mxu1  ;;  %v1258_v17 = vpop.f32.mrf.mxu0 }
 0x87e   :  { %v1771_v6 = vmul.f32 -1.442695, %v1215_v16  ;;  %v1773_v18 = vmul.f32 -1.442695, %v1258_v17 }
 0x87f   :  { %v1217_v19 = vpop.f32.mrf.mxu1  ;;  %v2027_v20 = vpop.f32.mrf.mxu0 }
 0x880   :  { %2208 = vpow2.f32 %v1771_v6  ;;  %v1772_v21 = vmul.f32 -1.442695, %v1217_v19 }
 0x881   :  { %2210 = vpow2.f32 %v1773_v18  ;;  %v1219_v23 = vpop.f32.mrf.mxu1  ;;  %v1261_v25 = vpop.f32.mrf.mxu0 }
 0x882   :  { %2212 = vpow2.f32 %v1772_v21  ;;  %v1774_v26 = vmul.f32 -1.442695, %v1219_v23  ;;  %v1776_v27 = vmul.f32 -1.442695, %v1261_v25 }
 0x883   :  { %v1221_v28 = vpop.f32.mrf.mxu1  ;;  %v2028_v29 = vpop.f32.mrf.mxu0 }
 0x884   :  { %2214 = vpow2.f32 %v1774_v26  ;;  %v1775_v30 = vmul.f32 -1.442695, %v1221_v28 }
 0x885   :  { %2216 = vpow2.f32 %v1776_v27 }
 0x886   :  { %2218 = vpow2.f32 %v1775_v30 }
 0x88d   :  { %v2209_v31 = vpop.eup %2208 }
 0x88e   :  { %v2211_v32 = vpop.eup %2210  ;;  %v1283_v33 = vadd.f32 1.0, %v2209_v31 }
 0x88f   :  { %v2213_v34 = vpop.eup %2212  ;;  %v1285_v35 = vadd.f32 1.0, %v2211_v32 }
 0x890   :  { %v1284_v36 = vadd.f32 1.0, %v2213_v34  ;;  %2220 = vrcp.f32 %v1283_v33 }
 0x891   :  { %v2215_v37 = vpop.eup %2214  ;;  %2222 = vrcp.f32 %v1285_v35 }
 0x892   :  { %v2217_v38 = vpop.eup %2216  ;;  %v1286_v39 = vadd.f32 1.0, %v2215_v37  ;;  %2224 = vrcp.f32 %v1284_v36 }
 0x893   :  { %v2219_v40 = vpop.eup %2218  ;;  %v1288_v41 = vadd.f32 1.0, %v2217_v38 }
 0x894   :  { %2226 = vrcp.f32 %v1286_v39  ;;  %v1287_v42 = vadd.f32 1.0, %v2219_v40 }
 0x895   :  { %2228 = vrcp.f32 %v1288_v41 }
 0x896   :  { %2230 = vrcp.f32 %v1287_v42 }
 0x89d   :  { %v1456_v43 = vpop.f32.mrf.mxu1  ;;  %v2221_v44 = vpop.eup %2220 }
 0x89e   :  { %v2223_v45 = vpop.eup %2222  ;;  %v1301_v57 = vmul.f32 %v2221_v44, %v1215_v16 }
 0x89f   :  { %v2047_v46 = vpop.f32.mrf.mxu1  ;;  %v2225_v22 = vpop.eup %2224  ;;  %v1303_v51 = vmul.f32 %v2223_v45, %v1258_v17 }
 0x8a0   :  { %v1302_v55 = vmul.f32 %v2225_v22, %v1217_v19 }
 0x8a1   :  { %v2227_v47 = vpop.eup %2226  ;;  %v1459_v48 = vpop.f32.mrf.mxu1 }
 0x8a2   :  { %v2229_v49 = vpop.eup %2228  ;;  %v1304_v52 = vmul.f32 %v2227_v47, %v1219_v23 }
 0x8a3   :  { %v2231_v50 = vpop.eup %2230  ;;  %v1306_v53 = vmul.f32 %v2229_v49, %v1261_v25  ;;  %v2048_v54 = vpop.f32.mrf.mxu1 }
 0x8a4   :  { %v1305_v24 = vmul.f32 %v2231_v50, %v1221_v28  ;;  %v1307_v61 = vpack.c.bf16 %v1304_v52, %v1301_v57 }
 0x8a5   :  { %v1309_v58 = vpack.c.bf16 %v1306_v53, %v1303_v51 }
 0x8a6   :  { %v1308_v59 = vpack.c.bf16 %v1305_v24, %v1302_v55 }
 0x8a7   :  { %2066 = vmatmul.mubr.bf16.vlgmr.msra.gmra.mxu1 %v1309_v58 }
 0x8a8   :  { %1639 = vmatprep.mubr.bf16.mxu0 %v1308_v59 }
 0x8a9   :  { %1640 = vmatmul.mubr.bf16.vlgmr.msra.gmra.mxu0 %v1307_v61 }
 0x967   :  { %v1682_v62 = vpop.f32.mrf.mxu1 }
 0x969   :  { %v2067_v63 = vpop.f32.mrf.mxu1  ;;  %v1886_v0 = vpop.f32.mrf.mxu0 }
 0x96b   :  { %v1685_v1 = vpop.f32.mrf.mxu1  ;;  %v1887_v2 = vpop.f32.mrf.mxu0 }
 0x96c   :  { %v1888_v3 = vadd.f32 %v1887_v2, %v1886_v0 }
 0x96d   :  { %v2068_v4 = vpop.f32.mrf.mxu1  ;;  %v1889_v5 = vpop.f32.mrf.mxu0 }
 0x96e   :  { %v1642_v7 = vadd.f32 %v1888_v3, %v1456_v43 }
 0x96f   :  { %v1890_v8 = vpop.f32.mrf.mxu0 }
 0x970   :  { %v1683_v9 = vadd.f32 %v1682_v62, %v1642_v7  ;;  %v1891_v10 = vadd.f32 %v1890_v8, %v1889_v5 }
 0x972   :  { %v1689_v11 = vadd.f32 %v1683_v9, %v2576_v56  ;;  %v1645_v12 = vadd.f32 %v1891_v10, %v1459_v48 }
 0x974   :  { %1691 = vst [vmem:[#allocation3] sm:$0xff] %v1689_v11  ;;  %v1686_v13 = vadd.f32 %v1685_v1, %v1645_v12 }
 0x976   :  { %v1690_v14 = vadd.f32 %v1686_v13, %v2583_v60 }
 0x978   :  { %1692 = vst [vmem:[#allocation3 + $0x8] sm:$0xff] %v1690_v14 }
 0x979   :  { %2245 = shalt.err (!%p2242_p4)
}
 0x97a   :  { %s2265_s23 = smov 128   ;;  %s2266_s24 = smov 8  }
 0x97b   :  { %1704 = dma.vmem_to_hbm [thread:$0]  %s1699_s22, 256, %s2796_s10, [#allocation4], %s2265_s23, %s2265_s23, %s2266_s24  }
 0x97c   :  { %2254 = dma.done.wait [#allocation4], 256  }
 0x97d   :  { %2255 = vsyncadd [#allocation4], 4294967040 }
 0x97e   :  { %1708 = vsyncpa [#allocation4], 1 }

</bundles_post_ra>
